<compile_context>
chip_gen: v5e
topology: v5e:2x2
jax: 0.10.0
libtpu: 0.0.40
codegen_flags: <defaults>
</compile_context>

<pallas_src>
import jax
import jax.numpy as jnp
from jax.experimental import pallas as pl
from jax.experimental.pallas import tpu as pltpu


LANE = 128


def _round_up(n, m=LANE):
    return ((n + m - 1) // m) * m


def _critic_kernel(
    x_ref, u_ref,
    w1x_ref, w1u_ref, b1_ref,          # layer 1, both heads fused on lane axis
    w2a_ref, b2a_ref,                  # layer 2, head Q1
    w2b_ref, b2b_ref,                  # layer 2, head Q2
    w3_ref, b3_ref,                    # layer 3, both heads fused (lane-dense)
    out_ref,
):
    h1p = w2a_ref.shape[0]             # padded hidden-1 width (multiple of 128)

    x = x_ref[...].astype(jnp.bfloat16)
    u = u_ref[...].astype(jnp.bfloat16)

    # ---- Layer 1 (both heads at once); concat(x, u) folded into two matmuls.
    h1 = (jnp.dot(x, w1x_ref[...], preferred_element_type=jnp.float32)
          + jnp.dot(u, w1u_ref[...], preferred_element_type=jnp.float32)
          + b1_ref[...])
    h1 = jnp.maximum(h1, 0.0).astype(jnp.bfloat16)          # (B, 2*H1P)
    h1a = h1[:, :h1p]                                        # lane-tile aligned slices
    h1b = h1[:, h1p:]

    # ---- Layer 2 (per head).
    h2a = jnp.maximum(
        jnp.dot(h1a, w2a_ref[...], preferred_element_type=jnp.float32) + b2a_ref[...],
        0.0)
    h2b = jnp.maximum(
        jnp.dot(h1b, w2b_ref[...], preferred_element_type=jnp.float32) + b2b_ref[...],
        0.0)

    # ---- Layer 3: stack heads on the sublane axis, one lane-dense matmul.
    h2 = jnp.concatenate([h2a, h2b], axis=0).astype(jnp.bfloat16)   # (2B, H2P)
    out_ref[...] = (jnp.dot(h2, w3_ref[...], preferred_element_type=jnp.float32)
                    + b3_ref[...])                                  # (2B, 128)


def critic_forward(x, u, packed):
    """Pallas equivalent of Critic.forward(x, u) -> (q1, q2)."""
    batch = x.shape[0]
    args = [
        x, u,
        packed["w1x"], packed["w1u"], packed["b1"],
        packed["w2a"], packed["b2a"],
        packed["w2b"], packed["b2b"],
        packed["w3"], packed["b3"],
    ]
    out = pl.pallas_call(
        _critic_kernel,
        out_shape=jax.ShapeDtypeStruct((2 * batch, LANE), jnp.float32),
        in_specs=[pl.BlockSpec(memory_space=pltpu.VMEM) for _ in args],
        out_specs=pl.BlockSpec(memory_space=pltpu.VMEM),
    )(*args)
    q1 = out[:batch, 0:1]
    q2 = out[batch:, 1:2]
    return q1, q2


def init_raw_params(key, state_dim, action_dim, dims_inner=(400, 300)):
    """Torch-style per-layer params: weight [in, out], bias [1, out], f32.

    Init mirrors torch.nn.Linear: uniform(-1/sqrt(fan_in), 1/sqrt(fan_in)).
    """
    dims = [state_dim + action_dim] + list(dims_inner) + [1]
    params = {}
    for head in ("q1", "q2"):
        layers = []
        for i in range(1, len(dims)):
            key, kw, kb = jax.random.split(key, 3)
            fan_in, fan_out = dims[i - 1], dims[i]
            bound = 1.0 / jnp.sqrt(jnp.float32(fan_in))
            w = jax.random.uniform(kw, (fan_in, fan_out), jnp.float32, -bound, bound)
            b = jax.random.uniform(kb, (1, fan_out), jnp.float32, -bound, bound)
            layers.append((w, b))
        params[head] = layers
    return params


def pack_params(raw, state_dim, action_dim):
    """Fuse the twin heads, zero-pad hidden dims to lane multiples, cast weights
    to bf16 (biases stay f32). Zero padding keeps the math exact."""
    (w1a, b1a), (w2a, b2a), (w3a, b3a) = raw["q1"]
    (w1b, b1b), (w2b, b2b), (w3b, b3b) = raw["q2"]
    h1, h2 = w1a.shape[1], w2a.shape[1]
    h1p, h2p = _round_up(h1), _round_up(h2)

    def padw(w, rows, cols):
        return jnp.pad(w, ((0, rows - w.shape[0]), (0, cols - w.shape[1])))

    def padb(b, cols):
        return jnp.pad(b, ((0, 0), (0, cols - b.shape[1])))

    # Layer 1: both heads side-by-side on the output axis; split rows by x / u.
    w1_both = jnp.concatenate(
        [padw(w1a, state_dim + action_dim, h1p),
         padw(w1b, state_dim + action_dim, h1p)], axis=1)
    # Layer 3: column 0 = Q1 head, column 1 = Q2 head, rest zero (lane pad).
    w3_both = jnp.concatenate(
        [padw(w3a, h2p, 1), padw(w3b, h2p, 1),
         jnp.zeros((h2p, LANE - 2), jnp.float32)], axis=1)
    b3_both = jnp.concatenate(
        [b3a, b3b, jnp.zeros((1, LANE - 2), jnp.float32)], axis=1)

    return {
        "w1x": w1_both[:state_dim].astype(jnp.bfloat16),
        "w1u": w1_both[state_dim:].astype(jnp.bfloat16),
        "b1": jnp.concatenate([padb(b1a, h1p), padb(b1b, h1p)], axis=1),
        "w2a": padw(w2a, h1p, h2p).astype(jnp.bfloat16),
        "b2a": padb(b2a, h2p),
        "w2b": padw(w2b, h1p, h2p).astype(jnp.bfloat16),
        "b2b": padb(b2b, h2p),
        "w3": w3_both.astype(jnp.bfloat16),
        "b3": b3_both,
    }


def critic_forward_ref(x, u, raw):
    """Pure-JAX reference mirroring the kernel's dtype flow
    (bf16 weights/activations into matmuls, f32 accumulation, f32 bias)."""
    xu = jnp.concatenate([x, u], axis=1)

    def head(h, layers):
        for i, (w, b) in enumerate(layers):
            h = jnp.dot(h.astype(jnp.bfloat16), w.astype(jnp.bfloat16),
                        preferred_element_type=jnp.float32) + b
            if i < len(layers) - 1:
                h = jnp.maximum(h, 0.0)
        return h

    return head(xu, raw["q1"]), head(xu, raw["q2"])


if __name__ == "__main__":
    # Small shapes consistent with the module: batch=8, state_dim=16,
    # action_dim=8, default hidden dims [400, 300].
    batch, state_dim, action_dim = 8, 16, 8

    key = jax.random.PRNGKey(0)
    kx, ku, kp = jax.random.split(key, 3)
    x = jax.random.normal(kx, (batch, state_dim), jnp.float32)
    u = jax.random.normal(ku, (batch, action_dim), jnp.float32)

    raw = init_raw_params(kp, state_dim, action_dim, dims_inner=(400, 300))
    packed = pack_params(raw, state_dim, action_dim)

    q1, q2 = critic_forward(x, u, packed)
    q1 = jax.block_until_ready(q1)
    q2 = jax.block_until_ready(q2)

    q1_ref, q2_ref = critic_forward_ref(x, u, raw)
    assert q1.shape == (batch, 1) and q2.shape == (batch, 1)
    assert jnp.allclose(q1, q1_ref, atol=2e-3, rtol=2e-3), \
        float(jnp.max(jnp.abs(q1 - q1_ref)))
    assert jnp.allclose(q2, q2_ref, atol=2e-3, rtol=2e-3), \
        float(jnp.max(jnp.abs(q2 - q2_ref)))

    print("KERNEL_OK")
</pallas_src>

<mosaic_0001>
module attributes {stable_mosaic.version = 11 : i64} {
  func.func @_critic_kernel(%arg0: memref<8x16xf32, #tpu.memory_space<vmem>>, %arg1: memref<8x8xf32, #tpu.memory_space<vmem>>, %arg2: memref<16x1024xbf16, #tpu.memory_space<vmem>>, %arg3: memref<8x1024xbf16, #tpu.memory_space<vmem>>, %arg4: memref<1x1024xf32, #tpu.memory_space<vmem>>, %arg5: memref<512x384xbf16, #tpu.memory_space<vmem>>, %arg6: memref<1x384xf32, #tpu.memory_space<vmem>>, %arg7: memref<512x384xbf16, #tpu.memory_space<vmem>>, %arg8: memref<1x384xf32, #tpu.memory_space<vmem>>, %arg9: memref<384x128xbf16, #tpu.memory_space<vmem>>, %arg10: memref<1x128xf32, #tpu.memory_space<vmem>>, %arg11: memref<16x128xf32, #tpu.memory_space<vmem>>) attributes {dimension_semantics = [], scalar_prefetch = 0 : i64, scratch_operands = 0 : i64, tpu.core_type = #tpu.core_type<tc>} {
    %c0 = arith.constant 0 : index
    %c0_0 = arith.constant 0 : index
    %0 = vector.load %arg0[%c0, %c0_0] : memref<8x16xf32, #tpu.memory_space<vmem>>, vector<8x16xf32>
    %1 = arith.truncf %0 : vector<8x16xf32> to vector<8x16xbf16>
    %c0_1 = arith.constant 0 : index
    %c0_2 = arith.constant 0 : index
    %2 = vector.load %arg1[%c0_1, %c0_2] : memref<8x8xf32, #tpu.memory_space<vmem>>, vector<8x8xf32>
    %3 = arith.truncf %2 : vector<8x8xf32> to vector<8x8xbf16>
    %c0_3 = arith.constant 0 : index
    %c0_4 = arith.constant 0 : index
    %4 = vector.load %arg2[%c0_3, %c0_4] : memref<16x1024xbf16, #tpu.memory_space<vmem>>, vector<16x1024xbf16>
    %cst = arith.constant dense<0.000000e+00> : vector<8x1024xf32>
    %5 = tpu.matmul %1, %4, %cst {dimension_numbers = #tpu.dot_dimension_numbers<[1], [0], [0], [1], [0, 0, 1, 1], [], []>} : vector<8x16xbf16>, vector<16x1024xbf16>, vector<8x1024xf32> -> vector<8x1024xf32>
    %c0_5 = arith.constant 0 : index
    %c0_6 = arith.constant 0 : index
    %6 = vector.load %arg3[%c0_5, %c0_6] : memref<8x1024xbf16, #tpu.memory_space<vmem>>, vector<8x1024xbf16>
    %cst_7 = arith.constant dense<0.000000e+00> : vector<8x1024xf32>
    %7 = tpu.matmul %3, %6, %cst_7 {dimension_numbers = #tpu.dot_dimension_numbers<[1], [0], [0], [1], [0, 0, 1, 1], [], []>} : vector<8x8xbf16>, vector<8x1024xbf16>, vector<8x1024xf32> -> vector<8x1024xf32>
    %8 = arith.addf %5, %7 : vector<8x1024xf32>
    %c0_8 = arith.constant 0 : index
    %c0_9 = arith.constant 0 : index
    %9 = vector.load %arg4[%c0_8, %c0_9] : memref<1x1024xf32, #tpu.memory_space<vmem>>, vector<1x1024xf32>
    %10 = vector.broadcast %9 : vector<1x1024xf32> to vector<8x1024xf32>
    %11 = arith.addf %8, %10 : vector<8x1024xf32>
    %cst_10 = arith.constant 0.000000e+00 : f32
    %12 = vector.broadcast %cst_10 : f32 to vector<8x1024xf32>
    %13 = arith.maximumf %11, %12 : vector<8x1024xf32>
    %14 = arith.truncf %13 : vector<8x1024xf32> to vector<8x1024xbf16>
    %15 = vector.extract_strided_slice %14 {offsets = [0, 0], sizes = [8, 512], strides = [1, 1]} : vector<8x1024xbf16> to vector<8x512xbf16>
    %16 = vector.extract_strided_slice %14 {offsets = [0, 512], sizes = [8, 512], strides = [1, 1]} : vector<8x1024xbf16> to vector<8x512xbf16>
    %c0_11 = arith.constant 0 : index
    %c0_12 = arith.constant 0 : index
    %17 = vector.load %arg5[%c0_11, %c0_12] : memref<512x384xbf16, #tpu.memory_space<vmem>>, vector<512x384xbf16>
    %cst_13 = arith.constant dense<0.000000e+00> : vector<8x384xf32>
    %18 = tpu.matmul %15, %17, %cst_13 {dimension_numbers = #tpu.dot_dimension_numbers<[1], [0], [0], [1], [0, 0, 1, 1], [], []>} : vector<8x512xbf16>, vector<512x384xbf16>, vector<8x384xf32> -> vector<8x384xf32>
    %c0_14 = arith.constant 0 : index
    %c0_15 = arith.constant 0 : index
    %19 = vector.load %arg6[%c0_14, %c0_15] : memref<1x384xf32, #tpu.memory_space<vmem>>, vector<1x384xf32>
    %20 = vector.broadcast %19 : vector<1x384xf32> to vector<8x384xf32>
    %21 = arith.addf %18, %20 : vector<8x384xf32>
    %cst_16 = arith.constant 0.000000e+00 : f32
    %22 = vector.broadcast %cst_16 : f32 to vector<8x384xf32>
    %23 = arith.maximumf %21, %22 : vector<8x384xf32>
    %c0_17 = arith.constant 0 : index
    %c0_18 = arith.constant 0 : index
    %24 = vector.load %arg7[%c0_17, %c0_18] : memref<512x384xbf16, #tpu.memory_space<vmem>>, vector<512x384xbf16>
    %cst_19 = arith.constant dense<0.000000e+00> : vector<8x384xf32>
    %25 = tpu.matmul %16, %24, %cst_19 {dimension_numbers = #tpu.dot_dimension_numbers<[1], [0], [0], [1], [0, 0, 1, 1], [], []>} : vector<8x512xbf16>, vector<512x384xbf16>, vector<8x384xf32> -> vector<8x384xf32>
    %c0_20 = arith.constant 0 : index
    %c0_21 = arith.constant 0 : index
    %26 = vector.load %arg8[%c0_20, %c0_21] : memref<1x384xf32, #tpu.memory_space<vmem>>, vector<1x384xf32>
    %27 = vector.broadcast %26 : vector<1x384xf32> to vector<8x384xf32>
    %28 = arith.addf %25, %27 : vector<8x384xf32>
    %cst_22 = arith.constant 0.000000e+00 : f32
    %29 = vector.broadcast %cst_22 : f32 to vector<8x384xf32>
    %30 = arith.maximumf %28, %29 : vector<8x384xf32>
    %31 = tpu.concatenate %23, %30 in 0 : vector<8x384xf32>, vector<8x384xf32> -> vector<16x384xf32>
    %32 = arith.truncf %31 : vector<16x384xf32> to vector<16x384xbf16>
    %c0_23 = arith.constant 0 : index
    %c0_24 = arith.constant 0 : index
    %33 = vector.load %arg9[%c0_23, %c0_24] : memref<384x128xbf16, #tpu.memory_space<vmem>>, vector<384x128xbf16>
    %cst_25 = arith.constant dense<0.000000e+00> : vector<16x128xf32>
    %34 = tpu.matmul %32, %33, %cst_25 {dimension_numbers = #tpu.dot_dimension_numbers<[1], [0], [0], [1], [0, 0, 1, 1], [], []>} : vector<16x384xbf16>, vector<384x128xbf16>, vector<16x128xf32> -> vector<16x128xf32>
    %c0_26 = arith.constant 0 : index
    %c0_27 = arith.constant 0 : index
    %35 = vector.load %arg10[%c0_26, %c0_27] : memref<1x128xf32, #tpu.memory_space<vmem>>, vector<1x128xf32>
    %36 = vector.broadcast %35 : vector<1x128xf32> to vector<16x128xf32>
    %37 = arith.addf %34, %36 : vector<16x128xf32>
    %c0_28 = arith.constant 0 : index
    %c0_29 = arith.constant 0 : index
    %38 = vector.load %arg11[%c0_28, %c0_29] : memref<16x128xf32, #tpu.memory_space<vmem>>, vector<16x128xf32>
    tpu.vector_store %arg11[%c0_28, %c0_29], %37 {strides = array<i32>} : memref<16x128xf32, #tpu.memory_space<vmem>>, vector<16x128xf32>,
    return
  }
}

</mosaic_0001>

<bundles_post_ra>
// kernel: tpu_custom_call.1
= control target key start
LH: loop header
LB: loop body
LE: loop exit
PB: predicated region body
PF: predicated region fallthrough
CT: control target
= control target key end

     0   :  { %16 = vsyncpa [#allocation3], 0  ;;  %s4049_s0 = inlined_call_operand.hbm [shape: f32[8,16], index: 0, kind: input, shape index: {}]   ;;  %s4050_s1 = inlined_call_operand.hbm [shape: f32[8,8], index: 1, kind: input, shape index: {}]   ;;  %s4051_s2 = inlined_call_operand.hbm [shape: bf16[16,1024], index: 2, kind: input, shape index: {}]   ;;  %s4052_s3 = inlined_call_operand.hbm [shape: bf16[8,1024], index: 3, kind: input, shape index: {}]   ;;  %s4053_s4 = inlined_call_operand.hbm [shape: f32[1,1024], index: 4, kind: input, shape index: {}]   ;;  %s4054_s5 = inlined_call_operand.hbm [shape: bf16[512,384], index: 5, kind: input, shape index: {}]   ;;  %s4055_s6 = inlined_call_operand.vmem [shape: f32[1,384], index: 6, kind: input, shape index: {}]   ;;  %s4056_s7 = inlined_call_operand.hbm [shape: bf16[512,384], index: 7, kind: input, shape index: {}]   ;;  %s4057_s8 = inlined_call_operand.vmem [shape: f32[1,384], index: 8, kind: input, shape index: {}]   ;;  %s4058_s9 = inlined_call_operand.hbm [shape: bf16[384,128], index: 9, kind: input, shape index: {}]   ;;  %s4059_s10 = inlined_call_operand.vmem [shape: f32[1,128], index: 10, kind: input, shape index: {}]   ;;  %s4060_s11 = inlined_call_operand.hbm [shape: f32[16,128], index: 11, kind: output, shape index: {}]  }
   0x1   :  { %17 = vsyncpa [#allocation6], 0 }
   0x2   :  { %18 = vsyncpa [#allocation9], 0 }
   0x3   :  { %19 = vsyncpa [#allocation12], 0 }
   0x4   :  { %20 = vsyncpa [#allocation15], 0  ;;  %s38_s19 = sshll.u32 %s4050_s1, 4  ;;  %s39_s19 = int_to_ptr.hbm [resolvable:$true] %s38_s19 }
   0x5   :  { %21 = vsyncpa [#allocation4], 0  ;;  %s3802_s20 = smov [#allocation5]   ;;  %s62_s24 = sshll.u32 %s4052_s3, 4  ;;  %s63_s24 = int_to_ptr.hbm [resolvable:$true] %s62_s24 }
   0x6   :  { %s40_s21 = sshll.u32 %s3802_s20, 4  ;;  %s3803_s25 = smov [#allocation8]   ;;  %s41_s21 = int_to_ptr.vmem [resolvable:$true] %s40_s21 }
   0x7   :  { %43 = dma.hbm_to_vmem [thread:$0]  %s39_s19, 128, %s41_s21, [#allocation6]  }
   0x8   :  { %s64_s26 = sshll.u32 %s3803_s25, 4  ;;  %s83_s29 = sshll.u32 %s4054_s5, 4  ;;  %s65_s26 = int_to_ptr.vmem [resolvable:$true] %s64_s26  ;;  %s84_s29 = int_to_ptr.hbm [resolvable:$true] %s83_s29 }
   0x9   :  { %67 = dma.hbm_to_vmem [thread:$0]  %s63_s24, 512, %s65_s26, [#allocation9]  }
   0xa   :  { %s3804_s1 = smov [#allocation11]   ;;  %s27_s14 = sshll.u32 %s4049_s0, 4  ;;  %s28_s14 = int_to_ptr.hbm [resolvable:$true] %s27_s14 }
   0xb   :  { %s85_s30 = sshll.u32 %s3804_s1, 4  ;;  %s3805_s15 = smov 192   ;;  %s86_s30 = int_to_ptr.vmem [resolvable:$true] %s85_s30 }
   0xc   :  { %s3806_s3 = smov 12   ;;  %s3807_s16 = smov [#allocation2]  }
   0xd   :  { %91 = dma.hbm_to_vmem [thread:$0]  %s84_s29, 12288, %s86_s30, [#allocation12], %s3805_s15, %s3805_s15, %s3806_s3  }
   0xe   :  { %s29_s17 = sshll.u32 %s3807_s16, 4  ;;  %s48_s19 = sshll.u32 %s4051_s2, 4  ;;  %s30_s17 = int_to_ptr.vmem [resolvable:$true] %s29_s17  ;;  %s49_s19 = int_to_ptr.hbm [resolvable:$true] %s48_s19 }
   0xf   :  { %32 = dma.hbm_to_vmem [thread:$0]  %s28_s14, 128, %s30_s17, [#allocation3]  }
  0x10   :  { %s3808_s20 = smov [#allocation7]   ;;  %s73_s23 = sshll.u32 %s4053_s4, 4  ;;  %s74_s23 = int_to_ptr.hbm [resolvable:$true] %s73_s23 }
  0x11   :  { %s50_s21 = sshll.u32 %s3808_s20, 4  ;;  %s3809_s24 = smov 512   ;;  %s51_s21 = int_to_ptr.vmem [resolvable:$true] %s50_s21 }
  0x12   :  { %s3810_s25 = smov 32   ;;  %s3811_s26 = smov [#allocation10]  }
  0x13   :  { %56 = dma.hbm_to_vmem [thread:$0]  %s49_s19, 1024, %s51_s21, [#allocation6], %s3809_s24, %s3809_s24, %s3810_s25  }
  0x14   :  { %s75_s27 = sshll.u32 %s3811_s26, 4  ;;  %s98_s2 = sshll.u32 %s4056_s7, 4  ;;  %s76_s27 = int_to_ptr.vmem [resolvable:$true] %s75_s27  ;;  %s99_s2 = int_to_ptr.hbm [resolvable:$true] %s98_s2 }
  0x15   :  { %78 = dma.hbm_to_vmem [thread:$0]  %s74_s23, 128, %s76_s27, [#allocation9]  }
  0x16   :  { %s113_s12 = sshll.u32 %s4058_s9, 4  ;;  %s3812_s13 = smov [#allocation13]   ;;  %s114_s12 = int_to_ptr.hbm [resolvable:$true] %s113_s12 }
  0x17   :  { %s100_s14 = sshll.u32 %s3812_s13, 4  ;;  %s3813_s4 = smov [#allocation14]   ;;  %s101_s14 = int_to_ptr.vmem [resolvable:$true] %s100_s14 }
  0x18   :  { %106 = dma.hbm_to_vmem [thread:$0]  %s99_s2, 12288, %s101_s14, [#allocation12], %s3805_s15, %s3805_s15, %s3806_s3  }
  0x19   :  { %s115_s16 = sshll.u32 %s3813_s4, 4  ;;  %s3814_s17 = smov 64   ;;  %s116_s16 = int_to_ptr.vmem [resolvable:$true] %s115_s16 }
  0x1a   :  { %s3815_s7 = smov 4  }
  0x1b   :  { %121 = dma.hbm_to_vmem [thread:$0]  %s114_s12, 3072, %s116_s16, [#allocation15], %s3814_s17, %s3814_s17, %s3815_s7  }
  0x1c   :  { %3790 = dma.done.wait [#allocation3], 128  }
  0x1d   :  { %3791 = vsyncadd [#allocation3], 4294967168 }
  0x1e   :  { %3792 = dma.done.wait [#allocation6], 1152  }
  0x1f   :  { %3793 = vsyncadd [#allocation6], 4294966144 }
  0x20   :  { %3794 = dma.done.wait [#allocation9], 640  }
  0x21   :  { %3795 = vsyncadd [#allocation9], 4294966656 }
  0x22   :  { %3796 = dma.done.wait [#allocation12], 24576  }
  0x23   :  { %3797 = vsyncadd [#allocation12], 4294942720 }
  0x24   :  { %3798 = dma.done.wait [#allocation15], 3072  }
  0x25   :  { %3799 = vsyncadd [#allocation15], 4294964224  ;;  %v169_v0 = vld [vmem:[#allocation8] sm:$0xff]  ;;  %vm197_vm0 = vcmask 1043456   ;;  %v170_v1 = vld [vmem:[#allocation8 + $0x8] sm:$0xff]  ;;  %vm193_vm1 = vcmask 64512  }
  0x26   :  { %v171_v2 = vld [vmem:[#allocation8 + $0x10] sm:$0xff]  ;;  %v177_v3 = vunpack.c.l.b16 %v169_v0  ;;  %v178_v4 = vunpack.c.h.b16 %v169_v0  ;;  %v179_v5 = vunpack.c.l.b16 %v170_v1  ;;  %v159_v7 = vld [vmem:[#allocation5] sm:$0xff]  ;;  %v180_v10 = vunpack.c.h.b16 %v170_v1  ;;  %v2430_v17 = vld [vmem:[#allocation7] sm:$0xf]  ;;  %s3816_s18 = smov [#allocation16]   ;;  %s2403_s0 = sshll.u32 %s4060_s11, 4  ;;  %s2404_s0 = int_to_ptr.hbm [resolvable:$true] %s2403_s0 }
  0x27   :  { %v181_v6 = vunpack.c.l.b16 %v171_v2  ;;  %v172_v8 = vld [vmem:[#allocation8 + $0x18] sm:$0xff]  ;;  %v3909_v9 = vpack.c.bf16 %v159_v7, %v159_v7  ;;  %v182_v11 = vunpack.c.h.b16 %v171_v2  ;;  %v3336_v22 = vld [vmem:[#allocation7 + $0x1c] sm:$0xf0]  ;;  %v3332_v23 = vld [vmem:[#allocation7 + $0x4] sm:$0xf]  ;;  %vm366_vm2 = vcmask 130048  }
  0x28   :  { %v183_v12 = vunpack.c.l.b16 %v172_v8  ;;  %v185_v13 = vpack.c.b16 %v177_v3, %v177_v3  ;;  %v186_v14 = vpack.c.b16 %v178_v4, %v178_v4  ;;  %v187_v15 = vpack.c.b16 %v179_v5, %v179_v5  ;;  %v2432_v28 = vld [vmem:[#allocation7 + $0x20] sm:$0xf0]  ;;  %v2438_v31 = vld [vmem:[#allocation7 + $0x8] sm:$0xf]  ;;  %v2446_v39 = vld [vmem:[#allocation7 + $0x10] sm:$0xf] }
  0x29   :  { %v189_v16 = vpack.c.b16 %v181_v6, %v181_v6  ;;  %v188_v18 = vpack.c.b16 %v180_v10, %v180_v10  ;;  %v190_v19 = vpack.c.b16 %v182_v11, %v182_v11  ;;  %v184_v20 = vunpack.c.h.b16 %v172_v8  ;;  %v3337_v32 = vld [vmem:[#allocation7 + $0x24] sm:$0xf0]  ;;  %v3338_v40 = vld [vmem:[#allocation7 + $0x2c] sm:$0xf0]  ;;  %v3333_v43 = vld [vmem:[#allocation7 + $0xc] sm:$0xf] }
  0x2a   :  { %v191_v21 = vpack.c.b16 %v183_v12, %v183_v12  ;;  %v199_v24 = vsel %vm197_vm0, %v185_v13, 0  ;;  %v202_v25 = vsel %vm197_vm0, %v186_v14, 0  ;;  %v205_v26 = vsel %vm197_vm0, %v187_v15, 0  ;;  %v157_v42 = vld [vmem:[#allocation2] sm:$0xff]  ;;  %v2440_v44 = vld [vmem:[#allocation7 + $0x28] sm:$0xf0] }
  0x2b   :  { %v211_v27 = vsel %vm197_vm0, %v189_v16, 0  ;;  %229 = vmatpush.bf16.msra.mxu3 %v199_v24  ;;  %242 = vmatpush.bf16.msra.mxu1 %v202_v25  ;;  %v208_v29 = vsel %vm197_vm0, %v188_v18, 0  ;;  %v214_v30 = vsel %vm197_vm0, %v190_v19, 0  ;;  %v2431_v33 = vor.u32 %v3336_v22, %v2430_v17  ;;  %v3334_v45 = vld [vmem:[#allocation7 + $0x14] sm:$0xf]  ;;  %s2401_s19 = sshll.u32 %s3816_s18, 4  ;;  %s2402_s19 = int_to_ptr.vmem [resolvable:$true] %s2401_s19 }
  0x2c   :  { %255 = vmatpush.bf16.msra.mxu2 %v205_v26  ;;  %281 = vmatpush.bf16.msra.mxu0 %v211_v27  ;;  %v192_v34 = vpack.c.b16 %v184_v20, %v184_v20  ;;  %v217_v35 = vsel %vm197_vm0, %v191_v21, 0  ;;  %v2435_v36 = vor.u32 %v3332_v23, %v2432_v28  ;;  %v2439_v38 = vor.u32 %v3337_v32, %v2438_v31  ;;  %v2448_v46 = vld [vmem:[#allocation7 + $0x30] sm:$0xf0]  ;;  %v2454_v47 = vld [vmem:[#allocation7 + $0x18] sm:$0xf]  ;;  %s3818_s22 = smov 8  }
  0x2d   :  { %v2447_v41 = vor.u32 %v3338_v40, %v2446_v39  ;;  %v3339_v48 = vld [vmem:[#allocation7 + $0x34] sm:$0xf0]  ;;  %v158_v49 = vpack.c.bf16 %v157_v42, %v157_v42  ;;  %v2443_v50 = vor.u32 %v3333_v43, %v2440_v44  ;;  %v2451_v51 = vor.u32 %v3334_v45, %v2448_v46  ;;  %v3335_v53 = vld [vmem:[#allocation7 + $0x1c] sm:$0xf]  ;;  %v2554_v56 = vld [vmem:[#allocation11 + $0xa8] sm:$0xf] }
  0x2e   :  { %2420 = vmatmul.msk.bf16.vlgmr.msra.gmra.mxu3 %vm193_vm1, %v3909_v9  ;;  %2421 = vmatmul.msk.bf16.vlgmr.msra.gmra.mxu1 %vm193_vm1, %v3909_v9  ;;  %v220_v37 = vsel %vm197_vm0, %v192_v34, 0  ;;  %v2455_v52 = vor.u32 %v3339_v48, %v2454_v47  ;;  %v2456_v54 = vld [vmem:[#allocation7 + $0x38] sm:$0xf0]  ;;  %v2650_v58 = vld [vmem:[#allocation11 + $0x168] sm:$0xf] }
  0x2f   :  { %268 = vmatpush.bf16.msrb.mxu3 %v208_v29  ;;  %294 = vmatpush.bf16.msrb.mxu1 %v214_v30  ;;  %v2459_v55 = vor.u32 %v3335_v53, %v2456_v54  ;;  %v3362_v57 = vld [vmem:[#allocation11 + $0xb0] sm:$0xf0]  ;;  %v2542_v61 = vld [vmem:[#allocation11 + $0x90] sm:$0xf]  ;;  %v3359_v62 = vld [vmem:[#allocation11 + $0x98] sm:$0xf0] }
  0x30   :  { %2422 = vmatmul.msk.bf16.vlgmr.msra.gmra.mxu2 %vm193_vm1, %v3909_v9  ;;  %2424 = vmatmul.msk.bf16.vlgmr.msra.gmra.mxu0 %vm193_vm1, %v3909_v9  ;;  %v2555_v59 = vor.u32 %v3362_v57, %v2554_v56  ;;  %v3386_v60 = vld [vmem:[#allocation11 + $0x170] sm:$0xf0]  ;;  %v2638_v0 = vld [vmem:[#allocation11 + $0x150] sm:$0xf]  ;;  %v3383_v1 = vld [vmem:[#allocation11 + $0x158] sm:$0xf0]  ;;  %v2543_v2 = vor.u32 %v3359_v62, %v2542_v61 }
  0x31   :  { %307 = vmatpush.bf16.msrb.mxu2 %v217_v35  ;;  %377 = vmatpush.bf16.msrb.mxu0 %v2431_v33  ;;  %v2651_v63 = vor.u32 %v3386_v60, %v2650_v58  ;;  %v2639_v3 = vor.u32 %v3383_v1, %v2638_v0  ;;  %v2530_v4 = vld [vmem:[#allocation11 + $0x78] sm:$0xf]  ;;  %v3356_v5 = vld [vmem:[#allocation11 + $0x80] sm:$0xf0]  ;;  %v2518_v10 = vld [vmem:[#allocation11 + $0x60] sm:$0xf] }
  0x32   :  { %v2626_v6 = vld [vmem:[#allocation11 + $0x138] sm:$0xf]  ;;  %v3380_v7 = vld [vmem:[#allocation11 + $0x140] sm:$0xf0]  ;;  %v2531_v8 = vor.u32 %v3356_v5, %v2530_v4  ;;  %v3353_v11 = vld [vmem:[#allocation11 + $0x68] sm:$0xf0] }
  0x33   :  { %320 = vmatpush.bf16.msra.mxu3 %v220_v37  ;;  %390 = vmatpush.bf16.msra.mxu1 %v2435_v36  ;;  %v2614_v12 = vld [vmem:[#allocation11 + $0x120] sm:$0xf]  ;;  %v3377_v13 = vld [vmem:[#allocation11 + $0x128] sm:$0xf0]  ;;  %v2519_v14 = vor.u32 %v3353_v11, %v2518_v10  ;;  %v2506_v16 = vld [vmem:[#allocation11 + $0x48] sm:$0xf] }
  0x34   :  { %v2615_v15 = vor.u32 %v3377_v13, %v2614_v12  ;;  %v3350_v17 = vld [vmem:[#allocation11 + $0x50] sm:$0xf0]  ;;  %v2602_v18 = vld [vmem:[#allocation11 + $0x108] sm:$0xf]  ;;  %v2494_v22 = vld [vmem:[#allocation11 + $0x30] sm:$0xf] }
  0x35   :  { %403 = vmatpush.bf16.msra.mxu2 %v2439_v38  ;;  %429 = vmatpush.bf16.msra.mxu0 %v2447_v41  ;;  %v2507_v19 = vor.u32 %v3350_v17, %v2506_v16  ;;  %v3374_v20 = vld [vmem:[#allocation11 + $0x110] sm:$0xf0]  ;;  %v3347_v23 = vld [vmem:[#allocation11 + $0x38] sm:$0xf0]  ;;  %v2590_v24 = vld [vmem:[#allocation11 + $0xf0] sm:$0xf] }
  0x36   :  { %v2603_v21 = vor.u32 %v3374_v20, %v2602_v18  ;;  %v2495_v25 = vor.u32 %v3347_v23, %v2494_v22  ;;  %v3371_v26 = vld [vmem:[#allocation11 + $0xf8] sm:$0xf0]  ;;  %v2746_v28 = vld [vmem:[#allocation11 + $0x228] sm:$0xf]  ;;  %v3410_v29 = vld [vmem:[#allocation11 + $0x230] sm:$0xf0] }
  0x37   :  { %v2591_v27 = vor.u32 %v3371_v26, %v2590_v24  ;;  %v2842_v30 = vld [vmem:[#allocation11 + $0x2e8] sm:$0xf]  ;;  %v2747_v31 = vor.u32 %v3410_v29, %v2746_v28  ;;  %v3434_v32 = vld [vmem:[#allocation11 + $0x2f0] sm:$0xf0]  ;;  %v2482_v34 = vld [vmem:[#allocation11 + $0x18] sm:$0xf] }
  0x38   :  { %v2843_v33 = vor.u32 %v3434_v32, %v2842_v30  ;;  %v3344_v35 = vld [vmem:[#allocation11 + $0x20] sm:$0xf0]  ;;  %v2578_v36 = vld [vmem:[#allocation11 + $0xd8] sm:$0xf]  ;;  %v2734_v39 = vld [vmem:[#allocation11 + $0x210] sm:$0xf] }
  0x39   :  { %v2483_v37 = vor.u32 %v3344_v35, %v2482_v34  ;;  %v3368_v38 = vld [vmem:[#allocation11 + $0xe0] sm:$0xf0]  ;;  %v3407_v40 = vld [vmem:[#allocation11 + $0x218] sm:$0xf0]  ;;  %v2830_v43 = vld [vmem:[#allocation11 + $0x2d0] sm:$0xf] }
  0x3a   :  { %v2579_v41 = vor.u32 %v3368_v38, %v2578_v36  ;;  %v2735_v42 = vor.u32 %v3407_v40, %v2734_v39  ;;  %v3431_v44 = vld [vmem:[#allocation11 + $0x2d8] sm:$0xf0]  ;;  %v2470_v46 = vld [vmem:[#allocation11] sm:$0xf]  ;;  %v3341_v47 = vld [vmem:[#allocation11 + $0x8] sm:$0xf0] }
  0x3b   :  { %v2831_v45 = vor.u32 %v3431_v44, %v2830_v43  ;;  %v2566_v48 = vld [vmem:[#allocation11 + $0xc0] sm:$0xf]  ;;  %v2652_v56 = vld [vmem:[#allocation11 + $0x174] sm:$0xf0]  ;;  %v3428_v61 = vld [vmem:[#allocation11 + $0x2c0] sm:$0xf0] }
  0x3c   :  { %v2722_v57 = vld [vmem:[#allocation11 + $0x1f8] sm:$0xf]  ;;  %v3358_v0 = vld [vmem:[#allocation11 + $0x94] sm:$0xf]  ;;  %v2544_v1 = vld [vmem:[#allocation11 + $0x9c] sm:$0xf0] }
  0x3d   :  { %v2818_v60 = vld [vmem:[#allocation11 + $0x2b8] sm:$0xf]  ;;  %v2640_v4 = vld [vmem:[#allocation11 + $0x15c] sm:$0xf0]  ;;  %v3355_v12 = vld [vmem:[#allocation11 + $0x7c] sm:$0xf] }
  0x3e   :  { %2423 = vmatmul.msk.bf16.vlgmr.msrb.gmra.mxu3 %vm193_vm1, %v3909_v9  ;;  %2425 = vmatmul.msk.bf16.vlgmr.msrb.gmra.mxu1 %vm193_vm1, %v3909_v9  ;;  %v2710_v5 = vld [vmem:[#allocation11 + $0x1e0] sm:$0xf]  ;;  %v2532_v13 = vld [vmem:[#allocation11 + $0x84] sm:$0xf0]  ;;  %v3398_v18 = vld [vmem:[#allocation11 + $0x1d0] sm:$0xf0] }
  0x3f   :  { %416 = vmatpush.bf16.msrb.mxu3 %v2443_v50  ;;  %442 = vmatpush.bf16.msrb.mxu1 %v2451_v51  ;;  %v3365_v50 = vld [vmem:[#allocation11 + $0xc8] sm:$0xf0]  ;;  %v2628_v16 = vld [vmem:[#allocation11 + $0x144] sm:$0xf0]  ;;  %v3422_v22 = vld [vmem:[#allocation11 + $0x290] sm:$0xf0] }
  0x40   :  { %2426 = vmatmul.msk.bf16.vlgmr.msrb.gmra.mxu2 %vm193_vm1, %v3909_v9  ;;  %2460 = vmatmul.msk.bf16.vlgmr.msrb.gmra.mxu0 %vm366_vm2, %v158_v49  ;;  %v3361_v51 = vld [vmem:[#allocation11 + $0xac] sm:$0xf]  ;;  %v2567_v53 = vor.u32 %v3365_v50, %v2566_v48  ;;  %v2698_v17 = vld [vmem:[#allocation11 + $0x1c8] sm:$0xf]  ;;  %v3352_v23 = vld [vmem:[#allocation11 + $0x64] sm:$0xf] }
  0x41   :  { %455 = vmatpush.bf16.msrb.mxu2 %v2455_v52  ;;  %1174 = vmatpush.bf16.msrb.mxu0 %v2555_v59  ;;  %v2556_v52 = vld [vmem:[#allocation11 + $0xb4] sm:$0xf0]  ;;  %v3404_v59 = vld [vmem:[#allocation11 + $0x200] sm:$0xf0]  ;;  %v2699_v20 = vor.u32 %v3398_v18, %v2698_v17  ;;  %v2686_v30 = vld [vmem:[#allocation11 + $0x1b0] sm:$0xf] }
  0x42   :  { %v2559_v54 = vor.u32 %v3361_v51, %v2556_v52  ;;  %v2723_v62 = vor.u32 %v3404_v59, %v2722_v57  ;;  %v3376_v26 = vld [vmem:[#allocation11 + $0x124] sm:$0xf]  ;;  %v2782_v32 = vld [vmem:[#allocation11 + $0x270] sm:$0xf]  ;;  %v3419_v34 = vld [vmem:[#allocation11 + $0x278] sm:$0xf0] }
  0x43   :  { %v2783_v35 = vor.u32 %v3419_v34, %v2782_v32  ;;  %v3349_v36 = vld [vmem:[#allocation11 + $0x4c] sm:$0xf]  ;;  %v2604_v40 = vld [vmem:[#allocation11 + $0x114] sm:$0xf0]  ;;  %v3346_v50 = vld [vmem:[#allocation11 + $0x34] sm:$0xf] }
  0x44   :  { %v3373_v38 = vld [vmem:[#allocation11 + $0x10c] sm:$0xf]  ;;  %v2496_v51 = vld [vmem:[#allocation11 + $0x3c] sm:$0xf0]  ;;  %v3370_v52 = vld [vmem:[#allocation11 + $0xf4] sm:$0xf] }
  0x45   :  { %1175 = vmatpush.bf16.msrb.mxu0 %v2543_v2  ;;  %v2547_v2 = vor.u32 %v3358_v0, %v2544_v1  ;;  %v2607_v44 = vor.u32 %v3373_v38, %v2604_v40  ;;  %v2758_v59 = vld [vmem:[#allocation11 + $0x240] sm:$0xf]  ;;  %v3433_v0 = vld [vmem:[#allocation11 + $0x2ec] sm:$0xf]  ;;  %v2844_v1 = vld [vmem:[#allocation11 + $0x2f4] sm:$0xf0] }
  0x46   :  { %v3430_v17 = vld [vmem:[#allocation11 + $0x2d4] sm:$0xf]  ;;  %v2832_v18 = vld [vmem:[#allocation11 + $0x2dc] sm:$0xf0]  ;;  %v2808_v40 = vld [vmem:[#allocation11 + $0x2ac] sm:$0xf0] }
  0x49   :  { %1176 = vmatpush.bf16.msrb.mxu0 %v2531_v8  ;;  %v2806_v8 = vld [vmem:[#allocation11 + $0x2a0] sm:$0xf] }
  0x4d   :  { %1177 = vmatpush.bf16.msrb.mxu0 %v2519_v14  ;;  %v3379_v14 = vld [vmem:[#allocation11 + $0x13c] sm:$0xf] }
  0x4e   :  { %2427 = vmatmul.msk.bf16.vlgmr.msra.gmra.mxu3 %vm193_vm1, %v3909_v9  ;;  %2461 = vmatmul.msk.bf16.vlgmr.msra.gmra.mxu1 %vm366_vm2, %v158_v49  ;;  %v2627_v9 = vor.u32 %v3380_v7, %v2626_v6  ;;  %v3401_v7 = vld [vmem:[#allocation11 + $0x1e8] sm:$0xf0] }
  0x4f   :  { %468 = vmatpush.bf16.msra.mxu3 %v2459_v55  ;;  %1187 = vmatpush.bf16.msra.mxu1 %v2651_v63  ;;  %v3385_v55 = vld [vmem:[#allocation11 + $0x16c] sm:$0xf]  ;;  %v2819_v63 = vor.u32 %v3428_v61, %v2818_v60  ;;  %v2711_v10 = vor.u32 %v3401_v7, %v2710_v5  ;;  %v3343_v5 = vld [vmem:[#allocation11 + $0x1c] sm:$0xf] }
  0x50   :  { %2462 = vmatmul.msk.bf16.vlgmr.msra.gmra.mxu2 %vm366_vm2, %v158_v49  ;;  %2464 = vmatmul.msk.bf16.vlgmr.msra.gmra.mxu0 %vm366_vm2, %v158_v49  ;;  %v2655_v58 = vor.u32 %v3385_v55, %v2652_v56  ;;  %v2662_v55 = vld [vmem:[#allocation11 + $0x180] sm:$0xf]  ;;  %v3389_v56 = vld [vmem:[#allocation11 + $0x188] sm:$0xf0]  ;;  %v3367_v7 = vld [vmem:[#allocation11 + $0xdc] sm:$0xf] }
  0x51   :  { %1178 = vmatpush.bf16.msrb.mxu0 %v2507_v19  ;;  %1200 = vmatpush.bf16.msra.mxu2 %v2747_v31  ;;  %v2631_v19 = vor.u32 %v3379_v14, %v2628_v16  ;;  %v3395_v31 = vld [vmem:[#allocation11 + $0x1b8] sm:$0xf0]  ;;  %v3413_v60 = vld [vmem:[#allocation11 + $0x248] sm:$0xf0]  ;;  %v2736_v14 = vld [vmem:[#allocation11 + $0x21c] sm:$0xf0] }
  0x52   :  { %v3409_v61 = vld [vmem:[#allocation11 + $0x22c] sm:$0xf] }
  0x53   :  { %1188 = vmatpush.bf16.msra.mxu1 %v2639_v3  ;;  %v3382_v3 = vld [vmem:[#allocation11 + $0x154] sm:$0xf] }
  0x54   :  { %v2643_v6 = vor.u32 %v3382_v3, %v2640_v4  ;;  %v2847_v4 = vor.u32 %v3433_v0, %v2844_v1 }
  0x55   :  { %1179 = vmatpush.bf16.msrb.mxu0 %v2495_v25  ;;  %1201 = vmatpush.bf16.msra.mxu2 %v2735_v42  ;;  %v2520_v25 = vld [vmem:[#allocation11 + $0x6c] sm:$0xf0]  ;;  %v3392_v42 = vld [vmem:[#allocation11 + $0x1a0] sm:$0xf0] }
  0x56   :  { %v2523_v28 = vor.u32 %v3352_v23, %v2520_v25  ;;  %v3364_v23 = vld [vmem:[#allocation11 + $0xc4] sm:$0xf] }
  0x57   :  { %1189 = vmatpush.bf16.msra.mxu1 %v2627_v9  ;;  %v3425_v9 = vld [vmem:[#allocation11 + $0x2a8] sm:$0xf0] }
  0x58   :  { %v2807_v11 = vor.u32 %v3425_v9, %v2806_v8 }
  0x59   :  { %1180 = vmatpush.bf16.msrb.mxu0 %v2483_v37  ;;  %1202 = vmatpush.bf16.msra.mxu2 %v2723_v62  ;;  %v2508_v37 = vld [vmem:[#allocation11 + $0x54] sm:$0xf0]  ;;  %v2759_v62 = vor.u32 %v3413_v60, %v2758_v59 }
  0x5a   :  { %v2511_v39 = vor.u32 %v3349_v36, %v2508_v37  ;;  %v2712_v36 = vld [vmem:[#allocation11 + $0x1ec] sm:$0xf0] }
  0x5b   :  { %1190 = vmatpush.bf16.msra.mxu1 %v2615_v15  ;;  %v2535_v15 = vor.u32 %v3355_v12, %v2532_v13  ;;  %v3406_v13 = vld [vmem:[#allocation11 + $0x214] sm:$0xf] }
  0x5c   :  { %v2739_v16 = vor.u32 %v3406_v13, %v2736_v14 }
  0x5d   :  { %1203 = vmatpush.bf16.msra.mxu2 %v2711_v10  ;;  %v2580_v10 = vld [vmem:[#allocation11 + $0xe4] sm:$0xf0] }
  0x5e   :  { %2463 = vmatmul.msk.bf16.vlgmr.msrb.gmra.mxu3 %vm366_vm2, %v158_v49  ;;  %2465 = vmatmul.msk.bf16.vlgmr.msrb.gmra.mxu1 %vm366_vm2, %v158_v49  ;;  %v2583_v12 = vor.u32 %v3367_v7, %v2580_v10 }
  0x5f   :  { %1191 = vmatpush.bf16.msra.mxu1 %v2603_v21  ;;  %1213 = vmatpush.bf16.msrb.mxu3 %v2843_v33  ;;  %v2794_v21 = vld [vmem:[#allocation11 + $0x288] sm:$0xf]  ;;  %v2687_v33 = vor.u32 %v3395_v31, %v2686_v30 }
  0x60   :  { %2466 = vmatmul.msk.bf16.vlgmr.msrb.gmra.mxu2 %vm366_vm2, %v158_v49  ;;  %v2795_v24 = vor.u32 %v3422_v22, %v2794_v21  ;;  %v2472_v21 = vld [vmem:[#allocation11 + $0xc] sm:$0xf0]  ;;  %v2820_v31 = vld [vmem:[#allocation11 + $0x2c4] sm:$0xf0] }
  0x61   :  { %1204 = vmatpush.bf16.msra.mxu2 %v2699_v20  ;;  %v3340_v20 = vld [vmem:[#allocation11 + $0x4] sm:$0xf] }
  0x62   :  { %v2475_v22 = vor.u32 %v3340_v20, %v2472_v21 }
  0x63   :  { %1192 = vmatpush.bf16.msra.mxu1 %v2591_v27  ;;  %1214 = vmatpush.bf16.msrb.mxu3 %v2831_v45  ;;  %v2616_v27 = vld [vmem:[#allocation11 + $0x12c] sm:$0xf0] }
  0x64   :  { %v2619_v29 = vor.u32 %v3376_v26, %v2616_v27  ;;  %v3403_v26 = vld [vmem:[#allocation11 + $0x1fc] sm:$0xf]  ;;  %v2724_v27 = vld [vmem:[#allocation11 + $0x204] sm:$0xf0] }
  0x65   :  { %1205 = vmatpush.bf16.msra.mxu2 %v2687_v33  ;;  %v2727_v30 = vor.u32 %v3403_v26, %v2724_v27  ;;  %v3363_v26 = vld [vmem:[#allocation11 + $0xb8] sm:$0xf0]  ;;  %v2658_v27 = vld [vmem:[#allocation11 + $0x170] sm:$0xf] }
  0x67   :  { %1193 = vmatpush.bf16.msra.mxu1 %v2579_v41  ;;  %1215 = vmatpush.bf16.msrb.mxu3 %v2819_v63  ;;  %v2674_v41 = vld [vmem:[#allocation11 + $0x198] sm:$0xf] }
  0x68   :  { %v2675_v45 = vor.u32 %v3392_v42, %v2674_v41  ;;  %v2748_v63 = vld [vmem:[#allocation11 + $0x234] sm:$0xf0]  ;;  %v3397_v42 = vld [vmem:[#allocation11 + $0x1cc] sm:$0xf] }
  0x69   :  { %v2751_v3 = vor.u32 %v3409_v61, %v2748_v63  ;;  %v3391_v61 = vld [vmem:[#allocation11 + $0x19c] sm:$0xf] }
  0x6a   :  { %1206 = vmatpush.bf16.msra.mxu2 %v2675_v45 }
  0x6b   :  { %1194 = vmatpush.bf16.msra.mxu1 %v2567_v53  ;;  %1216 = vmatpush.bf16.msrb.mxu3 %v2807_v11  ;;  %v2499_v53 = vor.u32 %v3346_v50, %v2496_v51 }
  0x6e   :  { %2467 = vmatmul.msk.bf16.vlgmr.msra.gmra.mxu3 %vm366_vm2, %v158_v49  ;;  %v2471_v49 = vor.u32 %v3341_v47, %v2470_v46  ;;  %v2770_v46 = vld [vmem:[#allocation11 + $0x258] sm:$0xf]  ;;  %v3416_v47 = vld [vmem:[#allocation11 + $0x260] sm:$0xf0] }
  0x6f   :  { %1239 = vmatpush.bf16.msrb.mxu1 %v2655_v58  ;;  %1217 = vmatpush.bf16.msrb.mxu3 %v2795_v24  ;;  %v2663_v58 = vor.u32 %v3389_v56, %v2662_v55  ;;  %v2568_v24 = vld [vmem:[#allocation11 + $0xcc] sm:$0xf0]  ;;  %v2688_v55 = vld [vmem:[#allocation11 + $0x1bc] sm:$0xf0]  ;;  %v3418_v56 = vld [vmem:[#allocation11 + $0x274] sm:$0xf] }
  0x70   :  { %1181 = vmatpush.bf16.msrb.mxu0 %v2471_v49  ;;  %v2771_v49 = vor.u32 %v3416_v47, %v2770_v46  ;;  %v2571_v25 = vor.u32 %v3364_v23, %v2568_v24  ;;  %v3421_v46 = vld [vmem:[#allocation11 + $0x28c] sm:$0xf]  ;;  %v2796_v47 = vld [vmem:[#allocation11 + $0x294] sm:$0xf0]  ;;  %v2562_v23 = vld [vmem:[#allocation11 + $0xb0] sm:$0xf] }
  0x71   :  { %1207 = vmatpush.bf16.msra.mxu2 %v2663_v58  ;;  %v2799_v50 = vor.u32 %v3421_v46, %v2796_v47  ;;  %v3957_v58 = vld [vmem:[#allocation10] sm:$0xff] }
  0x72   :  { %v476_v0 = vperm.slane %v3957_v58, 0 }
  0x73   :  { %1240 = vmatpush.bf16.msrb.mxu1 %v2643_v6  ;;  %1218 = vmatpush.bf16.msrb.mxu3 %v2783_v35  ;;  %v2484_v6 = vld [vmem:[#allocation11 + $0x24] sm:$0xf0]  ;;  %v3400_v35 = vld [vmem:[#allocation11 + $0x1e4] sm:$0xf] }
  0x74   :  { %1226 = vmatpush.bf16.msra.mxu0 %v2559_v54  ;;  %v2592_v54 = vld [vmem:[#allocation11 + $0xfc] sm:$0xf0]  ;;  %v2487_v9 = vor.u32 %v3343_v5, %v2484_v6  ;;  %v2715_v38 = vor.u32 %v3400_v35, %v2712_v36  ;;  %v2550_v35 = vld [vmem:[#allocation11 + $0x98] sm:$0xf] }
  0x75   :  { %v2595_v57 = vor.u32 %v3370_v52, %v2592_v54  ;;  %1252 = vmatpush.bf16.msrb.mxu2 %v2751_v3  ;;  %v3415_v3 = vld [vmem:[#allocation11 + $0x25c] sm:$0xf] }
  0x77   :  { %1241 = vmatpush.bf16.msrb.mxu1 %v2631_v19  ;;  %1219 = vmatpush.bf16.msrb.mxu3 %v2771_v49  ;;  %v2835_v19 = vor.u32 %v3430_v17, %v2832_v18  ;;  %v2760_v17 = vld [vmem:[#allocation11 + $0x24c] sm:$0xf0] }
  0x78   :  { %1227 = vmatpush.bf16.msra.mxu0 %v2547_v2 }
  0x79   :  { %1253 = vmatpush.bf16.msrb.mxu2 %v2739_v16  ;;  %v3412_v16 = vld [vmem:[#allocation11 + $0x244] sm:$0xf] }
  0x7a   :  { %v2763_v18 = vor.u32 %v3412_v16, %v2760_v17  ;;  %v2610_v16 = vld [vmem:[#allocation11 + $0x110] sm:$0xf]  ;;  %v3375_v17 = vld [vmem:[#allocation11 + $0x118] sm:$0xf0] }
  0x7b   :  { %1242 = vmatpush.bf16.msrb.mxu1 %v2619_v29  ;;  %1220 = vmatpush.bf16.msrb.mxu3 %v2759_v62  ;;  %v2676_v62 = vld [vmem:[#allocation11 + $0x1a4] sm:$0xf0] }
  0x7c   :  { %1228 = vmatpush.bf16.msra.mxu0 %v2535_v15  ;;  %v2679_v1 = vor.u32 %v3391_v61, %v2676_v62  ;;  %v2526_v62 = vld [vmem:[#allocation11 + $0x68] sm:$0xf] }
  0x7d   :  { %1254 = vmatpush.bf16.msrb.mxu2 %v2727_v30 }
  0x7f   :  { %1243 = vmatpush.bf16.msrb.mxu1 %v2607_v44  ;;  %1265 = vmatpush.bf16.msra.mxu3 %v2847_v4  ;;  %v2700_v44 = vld [vmem:[#allocation11 + $0x1d4] sm:$0xf0]  ;;  %v2772_v4 = vld [vmem:[#allocation11 + $0x264] sm:$0xf0] }
  0x80   :  { %1229 = vmatpush.bf16.msra.mxu0 %v2523_v28  ;;  %v3427_v28 = vld [vmem:[#allocation11 + $0x2bc] sm:$0xf]  ;;  %v2703_v45 = vor.u32 %v3397_v42, %v2700_v44  ;;  %v2775_v6 = vor.u32 %v3415_v3, %v2772_v4  ;;  %v480_v42 = vperm.slane %v3957_v58, 4  ;;  %v2622_v3 = vld [vmem:[#allocation11 + $0x128] sm:$0xf] }
  0x81   :  { %v2823_v33 = vor.u32 %v3427_v28, %v2820_v31  ;;  %1255 = vmatpush.bf16.msrb.mxu2 %v2715_v38  ;;  %v3387_v28 = vld [vmem:[#allocation11 + $0x178] sm:$0xf0]  ;;  %v3360_v38 = vld [vmem:[#allocation11 + $0xa0] sm:$0xf0]  ;;  %v3378_v4 = vld [vmem:[#allocation11 + $0x130] sm:$0xf0] }
  0x82   :  { %v2551_v46 = vor.u32 %v3360_v38, %v2550_v35 }
  0x83   :  { %1244 = vmatpush.bf16.msrb.mxu1 %v2595_v57  ;;  %1266 = vmatpush.bf16.msra.mxu3 %v2835_v19  ;;  %v2784_v57 = vld [vmem:[#allocation11 + $0x27c] sm:$0xf0] }
  0x84   :  { %1230 = vmatpush.bf16.msra.mxu0 %v2511_v39  ;;  %v3424_v39 = vld [vmem:[#allocation11 + $0x2a4] sm:$0xf]  ;;  %v2787_v60 = vor.u32 %v3418_v56, %v2784_v57 }
  0x85   :  { %v2811_v41 = vor.u32 %v3424_v39, %v2808_v40  ;;  %1256 = vmatpush.bf16.msrb.mxu2 %v2703_v45  ;;  %v2646_v39 = vld [vmem:[#allocation11 + $0x158] sm:$0xf]  ;;  %v3384_v40 = vld [vmem:[#allocation11 + $0x160] sm:$0xf0]  ;;  %v481_v45 = vperm.slane %v3957_v58, 5 }
  0x86   :  { %v2647_v47 = vor.u32 %v3384_v40, %v2646_v39  ;;  %v2490_v39 = vld [vmem:[#allocation11 + $0x20] sm:$0xf] }
  0x87   :  { %1245 = vmatpush.bf16.msrb.mxu1 %v2583_v12  ;;  %1267 = vmatpush.bf16.msra.mxu3 %v2823_v33  ;;  %v2664_v12 = vld [vmem:[#allocation11 + $0x18c] sm:$0xf0]  ;;  %v2659_v33 = vor.u32 %v3387_v28, %v2658_v27 }
  0x88   :  { %1231 = vmatpush.bf16.msra.mxu0 %v2499_v53  ;;  %v3394_v53 = vld [vmem:[#allocation11 + $0x1b4] sm:$0xf] }
  0x89   :  { %v2691_v59 = vor.u32 %v3394_v53, %v2688_v55  ;;  %v3357_v53 = vld [vmem:[#allocation11 + $0x88] sm:$0xf0] }
  0x8a   :  { %v3381_v55 = vld [vmem:[#allocation11 + $0x148] sm:$0xf0] }
  0x8b   :  { %1246 = vmatpush.bf16.msrb.mxu1 %v2571_v25  ;;  %1268 = vmatpush.bf16.msra.mxu3 %v2811_v41 }
  0x8c   :  { %1232 = vmatpush.bf16.msra.mxu0 %v2487_v9  ;;  %1257 = vmatpush.bf16.msrb.mxu2 %v2691_v59  ;;  %v477_v9 = vperm.slane %v3957_v58, 1  ;;  %v478_v59 = vperm.slane %v3957_v58, 2 }
  0x8f   :  { %1269 = vmatpush.bf16.msra.mxu3 %v2799_v50  ;;  %v2538_v50 = vld [vmem:[#allocation11 + $0x80] sm:$0xf] }
  0x90   :  { %1233 = vmatpush.bf16.msra.mxu0 %v2475_v22  ;;  %1258 = vmatpush.bf16.msrb.mxu2 %v2679_v1  ;;  %v3354_v1 = vld [vmem:[#allocation11 + $0x70] sm:$0xf0] }
  0x93   :  { %1270 = vmatpush.bf16.msra.mxu3 %v2787_v60  ;;  %v2539_v60 = vor.u32 %v3357_v53, %v2538_v50  ;;  %v3408_v53 = vld [vmem:[#allocation11 + $0x220] sm:$0xf0] }
  0x97   :  { %1271 = vmatpush.bf16.msra.mxu3 %v2775_v6 }
  0x9b   :  { %1272 = vmatpush.bf16.msra.mxu3 %v2763_v18 }
  0xab   :  { %v3943_v43 = vpop.f32.mrf.mxu1 }
  0xad   :  { %v3945_v48 = vpop.f32.mrf.mxu0 }
  0xb1   :  { %v3947_v2 = vpop.f32.mrf.mxu3 }
  0xb3   :  { %v3949_v8 = vpop.f32.mrf.mxu2  ;;  %v246_v11 = vpop.f32.mrf.mxu1 }
  0xb4   :  { %v3388_v11 = vld [vmem:[#allocation11 + $0x184] sm:$0xf] }
  0xb5   :  { %v285_v15 = vpop.f32.mrf.mxu0 }
  0xb9   :  { %v233_v29 = vpop.f32.mrf.mxu3 }
  0xbb   :  { %v259_v32 = vpop.f32.mrf.mxu2  ;;  %v3951_v34 = vpop.f32.mrf.mxu1 }
  0xbc   :  { %v2563_v32 = vor.u32 %v3363_v26, %v2562_v23  ;;  %v3348_v26 = vld [vmem:[#allocation11 + $0x40] sm:$0xf0] }
  0xbd   :  { %v379_v37 = vpop.f32.mrf.mxu0 }
  0xbe   :  { %v380_v63 = vadd.f32 %v379_v37, %v3947_v2  ;;  %v2667_v2 = vor.u32 %v3388_v11, %v2664_v12  ;;  %v2623_v11 = vor.u32 %v3378_v4, %v2622_v3  ;;  %v2514_v12 = vld [vmem:[#allocation11 + $0x50] sm:$0xf]  ;;  %v3458_v3 = vld [vmem:[#allocation13 + $0xb0] sm:$0xf0] }
  0xc0   :  { %v492_v13 = vadd.f32 %v476_v0, %v380_v63  ;;  %1259 = vmatpush.bf16.msrb.mxu2 %v2667_v2  ;;  %v3351_v2 = vld [vmem:[#allocation11 + $0x58] sm:$0xf0] }
  0xc1   :  { %v3953_v49 = vpop.f32.mrf.mxu3  ;;  %v2515_v23 = vor.u32 %v3351_v2, %v2514_v12 }
  0xc2   :  { %v500_v20 = vmax.f32 %v492_v13, 0.0 }
  0xc3   :  { %v3955_v51 = vpop.f32.mrf.mxu2  ;;  %v298_v52 = vpop.f32.mrf.mxu1 }
  0xc5   :  { %v381_v54 = vpop.f32.mrf.mxu0 }
  0xc6   :  { %v2634_v54 = vld [vmem:[#allocation11 + $0x140] sm:$0xf] }
  0xc7   :  { %v2635_v61 = vor.u32 %v3381_v55, %v2634_v54 }
  0xc9   :  { %v272_v5 = vpop.f32.mrf.mxu3 }
  0xcb   :  { %v311_v7 = vpop.f32.mrf.mxu2  ;;  %v392_v10 = vpop.f32.mrf.mxu1 }
  0xcc   :  { %v393_v14 = vadd.f32 %v392_v10, %v3943_v43  ;;  %v479_v7 = vperm.slane %v3957_v58, 3  ;;  %v2527_v10 = vor.u32 %v3354_v1, %v2526_v62  ;;  %v3342_v62 = vld [vmem:[#allocation11 + $0x10] sm:$0xf0]  ;;  %v2938_v1 = vld [vmem:[#allocation13 + $0xa8] sm:$0xf] }
  0xcd   :  { %v431_v15 = vpop.f32.mrf.mxu0 }
  0xce   :  { %v493_v19 = vadd.f32 %v477_v9, %v393_v14  ;;  %v432_v41 = vadd.f32 %v431_v15, %v3945_v48  ;;  %v482_v9 = vperm.slane %v3957_v58, 6 }
  0xd0   :  { %v501_v21 = vmax.f32 %v493_v19, 0.0  ;;  %v496_v48 = vadd.f32 %v480_v42, %v432_v41  ;;  %v3345_v42 = vld [vmem:[#allocation11 + $0x28] sm:$0xf0] }
  0xd1   :  { %v3963_v22 = vpop.f32.mrf.mxu3 }
  0xd2   :  { %v508_v24 = vpack.c.bf16 %v501_v21, %v500_v20  ;;  %v504_v5 = vmax.f32 %v496_v48, 0.0  ;;  %v2838_v48 = vld [vmem:[#allocation11 + $0x2d8] sm:$0xf] }
  0xd3   :  { %v405_v25 = vpop.f32.mrf.mxu2  ;;  %v394_v43 = vpop.f32.mrf.mxu1 }
  0xd4   :  { %v650_v29 = vunpack.c.l.b16 %v508_v24  ;;  %v651_v30 = vunpack.c.h.b16 %v508_v24  ;;  %v406_v63 = vadd.f32 %v405_v25, %v3949_v8  ;;  %v2611_v24 = vor.u32 %v3375_v17, %v2610_v16  ;;  %v2502_v25 = vld [vmem:[#allocation11 + $0x38] sm:$0xf]  ;;  %v2926_v16 = vld [vmem:[#allocation13 + $0x90] sm:$0xf]  ;;  %v3455_v17 = vld [vmem:[#allocation13 + $0x98] sm:$0xf0] }
  0xd5   :  { %v433_v31 = vpop.f32.mrf.mxu0  ;;  %v2598_v43 = vld [vmem:[#allocation11 + $0xf8] sm:$0xf]  ;;  %v2503_v35 = vor.u32 %v3348_v26, %v2502_v25  ;;  %v3402_v26 = vld [vmem:[#allocation11 + $0x1f0] sm:$0xf0] }
  0xd6   :  { %v3965_v36 = vpack.c.b16 %v650_v29, %v650_v29  ;;  %v3967_v37 = vpack.c.b16 %v651_v30, %v651_v30  ;;  %v494_v13 = vadd.f32 %v478_v59, %v406_v63  ;;  %v2754_v29 = vld [vmem:[#allocation11 + $0x230] sm:$0xf]  ;;  %v2491_v59 = vor.u32 %v3345_v42, %v2490_v39  ;;  %v2574_v63 = vld [vmem:[#allocation11 + $0xc8] sm:$0xf]  ;;  %v3399_v39 = vld [vmem:[#allocation11 + $0x1d8] sm:$0xf0] }
  0xd7   :  { %v2850_v31 = vld [vmem:[#allocation11 + $0x2f0] sm:$0xf] }
  0xd8   :  { %1182 = vmatmul.bf16.vlgmr.msrb.gmra.mxu0 %v3965_v36  ;;  %1195 = vmatmul.bf16.vlgmr.msra.gmra.mxu1 %v3967_v37  ;;  %v502_v27 = vmax.f32 %v494_v13, 0.0 }
  0xd9   :  { %1278 = vmatpush.bf16.msrb.mxu0 %v2563_v32  ;;  %1291 = vmatpush.bf16.msra.mxu1 %v2659_v33  ;;  %v324_v44 = vpop.f32.mrf.mxu3  ;;  %v3435_v32 = vld [vmem:[#allocation11 + $0x2f8] sm:$0xf0] }
  0xda   :  { %v2586_v44 = vld [vmem:[#allocation11 + $0xe0] sm:$0xf]  ;;  %v2851_v50 = vor.u32 %v3435_v32, %v2850_v31  ;;  %v3452_v32 = vld [vmem:[#allocation13 + $0x80] sm:$0xf0] }
  0xdb   :  { %v407_v52 = vpop.f32.mrf.mxu2  ;;  %v444_v56 = vpop.f32.mrf.mxu1 }
  0xdc   :  { %v445_v57 = vadd.f32 %v444_v56, %v3951_v34  ;;  %v2742_v52 = vld [vmem:[#allocation11 + $0x218] sm:$0xf]  ;;  %v483_v56 = vperm.slane %v3957_v58, 7 }
  0xdd   :  { %1279 = vmatpush.bf16.msrb.mxu0 %v2551_v46  ;;  %1292 = vmatpush.bf16.msra.mxu1 %v2647_v47  ;;  %v2743_v4 = vor.u32 %v3408_v53, %v2742_v52  ;;  %v3473_v52 = vld [vmem:[#allocation13 + $0x128] sm:$0xf0] }
  0xde   :  { %v497_v0 = vadd.f32 %v481_v45, %v445_v57  ;;  %v3369_v45 = vld [vmem:[#allocation11 + $0xe8] sm:$0xf0]  ;;  %v3432_v57 = vld [vmem:[#allocation11 + $0x2e0] sm:$0xf0] }
  0xdf   :  { %v2839_v58 = vor.u32 %v3432_v57, %v2838_v48  ;;  %v3396_v48 = vld [vmem:[#allocation11 + $0x1c0] sm:$0xf0] }
  0xe0   :  { %v505_v6 = vmax.f32 %v497_v0, 0.0  ;;  %v3366_v0 = vld [vmem:[#allocation11 + $0xd0] sm:$0xf0]  ;;  %v3420_v57 = vld [vmem:[#allocation11 + $0x280] sm:$0xf0] }
  0xe1   :  { %1280 = vmatpush.bf16.msrb.mxu0 %v2539_v60  ;;  %1293 = vmatpush.bf16.msra.mxu1 %v2635_v61  ;;  %v418_v34 = vpop.f32.mrf.mxu3  ;;  %v2587_v60 = vor.u32 %v3369_v45, %v2586_v44  ;;  %v2478_v61 = vld [vmem:[#allocation11 + $0x8] sm:$0xf]  ;;  %v2575_v13 = vor.u32 %v3366_v0, %v2574_v63  ;;  %v3470_v0 = vld [vmem:[#allocation13 + $0x110] sm:$0xf0] }
  0xe2   :  { %v3979_v14 = vpack.c.bf16 %v505_v6, %v504_v5  ;;  %v419_v8 = vadd.f32 %v418_v34, %v3953_v49  ;;  %v3372_v49 = vld [vmem:[#allocation11 + $0x100] sm:$0xf0]  ;;  %v3034_v5 = vld [vmem:[#allocation13 + $0x168] sm:$0xf]  ;;  %v3482_v6 = vld [vmem:[#allocation13 + $0x170] sm:$0xf0]  ;;  %v2479_v12 = vor.u32 %v3342_v62, %v2478_v61 }
  0xe3   :  { %v457_v15 = vpop.f32.mrf.mxu2  ;;  %v446_v19 = vpop.f32.mrf.mxu1  ;;  %v2599_v38 = vor.u32 %v3372_v49, %v2598_v43  ;;  %v3405_v34 = vld [vmem:[#allocation11 + $0x208] sm:$0xf0]  ;;  %v3035_v2 = vor.u32 %v3482_v6, %v3034_v5  ;;  %v2927_v49 = vor.u32 %v3455_v17, %v2926_v16  ;;  %v2890_v61 = vld [vmem:[#allocation13 + $0x48] sm:$0xf]  ;;  %v3446_v62 = vld [vmem:[#allocation13 + $0x50] sm:$0xf0] }
  0xe4   :  { %v458_v18 = vadd.f32 %v457_v15, %v3955_v51  ;;  %v495_v20 = vadd.f32 %v479_v7, %v419_v8  ;;  %v3411_v51 = vld [vmem:[#allocation11 + $0x238] sm:$0xf0]  ;;  %v2730_v7 = vld [vmem:[#allocation11 + $0x200] sm:$0xf]  ;;  %v2939_v15 = vor.u32 %v3458_v3, %v2938_v1  ;;  %v2986_v63 = vld [vmem:[#allocation13 + $0x108] sm:$0xf] }
  0xe5   :  { %1281 = vmatpush.bf16.msrb.mxu0 %v2527_v10  ;;  %1294 = vmatpush.bf16.msra.mxu1 %v2623_v11  ;;  %v2755_v47 = vor.u32 %v3411_v51, %v2754_v29  ;;  %v3429_v10 = vld [vmem:[#allocation11 + $0x2c8] sm:$0xf0]  ;;  %v2778_v5 = vld [vmem:[#allocation11 + $0x260] sm:$0xf]  ;;  %v2766_v16 = vld [vmem:[#allocation11 + $0x248] sm:$0xf] }
  0xe6   :  { %v3983_v21 = vadd.f32 %v482_v9, %v458_v18  ;;  %v503_v28 = vmax.f32 %v495_v20, 0.0  ;;  %v2826_v9 = vld [vmem:[#allocation11 + $0x2c0] sm:$0xf]  ;;  %v2731_v18 = vor.u32 %v3405_v34, %v2730_v7  ;;  %v3022_v20 = vld [vmem:[#allocation13 + $0x150] sm:$0xf]  ;;  %v2891_v7 = vor.u32 %v3446_v62, %v2890_v61 }
  0xe7   :  { %v2827_v19 = vor.u32 %v3429_v10, %v2826_v9  ;;  %v3417_v6 = vld [vmem:[#allocation11 + $0x268] sm:$0xf0]  ;;  %v2987_v34 = vor.u32 %v3470_v0, %v2986_v63  ;;  %v2878_v9 = vld [vmem:[#allocation13 + $0x30] sm:$0xf]  ;;  %v3443_v10 = vld [vmem:[#allocation13 + $0x38] sm:$0xf0]  ;;  %v1471_v62 = vunpack.c.l.b16 %v3979_v14  ;;  %v1472_v63 = vunpack.c.h.b16 %v3979_v14 }
  0xe8   :  { %v509_v30 = vpack.c.bf16 %v503_v28, %v502_v27  ;;  %1234 = vmatmul.bf16.vlgmr.msra.gmra.mxu0 %v3965_v36  ;;  %1247 = vmatmul.bf16.vlgmr.msrb.gmra.mxu1 %v3967_v37  ;;  %v2814_v27 = vld [vmem:[#allocation11 + $0x2a8] sm:$0xf]  ;;  %v3426_v28 = vld [vmem:[#allocation11 + $0x2b0] sm:$0xf0]  ;;  %v506_v43 = vmax.f32 %v3983_v21, 0.0 }
  0xe9   :  { %1282 = vmatpush.bf16.msrb.mxu0 %v2515_v23  ;;  %1295 = vmatpush.bf16.msra.mxu1 %v2611_v24  ;;  %v420_v33 = vpop.f32.mrf.mxu3  ;;  %v3479_v23 = vld [vmem:[#allocation13 + $0x158] sm:$0xf0]  ;;  %v2718_v24 = vld [vmem:[#allocation11 + $0x1e8] sm:$0xf]  ;;  %v2815_v31 = vor.u32 %v3426_v28, %v2814_v27  ;;  %v2706_v21 = vld [vmem:[#allocation11 + $0x1d0] sm:$0xf]  ;;  %v4008_v14 = vpack.c.b16 %v1472_v63, %v1472_v63 }
  0xea   :  { %v652_v40 = vunpack.c.l.b16 %v509_v30  ;;  %v653_v41 = vunpack.c.h.b16 %v509_v30  ;;  %v3023_v29 = vor.u32 %v3479_v23, %v3022_v20  ;;  %v2914_v30 = vld [vmem:[#allocation13 + $0x78] sm:$0xf]  ;;  %v2719_v51 = vor.u32 %v3402_v26, %v2718_v24  ;;  %v3414_v17 = vld [vmem:[#allocation11 + $0x250] sm:$0xf0]  ;;  %v3226_v24 = vld [vmem:[#allocation13 + $0x2e8] sm:$0xf] }
  0xeb   :  { %v459_v46 = vpop.f32.mrf.mxu2  ;;  %v3010_v33 = vld [vmem:[#allocation13 + $0x138] sm:$0xf]  ;;  %v2915_v44 = vor.u32 %v3452_v32, %v2914_v30  ;;  %v2707_v53 = vor.u32 %v3399_v39, %v2706_v21  ;;  %v2879_v20 = vor.u32 %v3443_v10, %v2878_v9  ;;  %v3440_v27 = vld [vmem:[#allocation13 + $0x20] sm:$0xf0]  ;;  %v3214_v32 = vld [vmem:[#allocation13 + $0x2d0] sm:$0xf]  ;;  %v4006_v10 = vpack.c.b16 %v1471_v62, %v1471_v62 }
  0xec   :  { %v3987_v54 = vpack.c.b16 %v652_v40, %v652_v40  ;;  %v3989_v55 = vpack.c.b16 %v653_v41, %v653_v41  ;;  %v2802_v40 = vld [vmem:[#allocation11 + $0x290] sm:$0xf]  ;;  %v3423_v41 = vld [vmem:[#allocation11 + $0x298] sm:$0xf0]  ;;  %v2902_v46 = vld [vmem:[#allocation13 + $0x60] sm:$0xf] }
  0xed   :  { %1283 = vmatpush.bf16.msrb.mxu0 %v2503_v35  ;;  %1296 = vmatpush.bf16.msra.mxu1 %v2599_v38  ;;  %v3476_v35 = vld [vmem:[#allocation13 + $0x140] sm:$0xf0]  ;;  %v2866_v26 = vld [vmem:[#allocation13 + $0x18] sm:$0xf]  ;;  %v3527_v21 = vld [vmem:[#allocation13 + $0x2d8] sm:$0xf0] }
  0xee   :  { %1208 = vmatmul.bf16.vlgmr.msra.gmra.mxu2 %v3987_v54  ;;  %1221 = vmatmul.bf16.vlgmr.msrb.gmra.mxu3 %v3989_v55  ;;  %v3011_v45 = vor.u32 %v3476_v35, %v3010_v33  ;;  %v2962_v28 = vld [vmem:[#allocation13 + $0xd8] sm:$0xf]  ;;  %v2867_v33 = vor.u32 %v3440_v27, %v2866_v26  ;;  %v2854_v39 = vld [vmem:[#allocation13] sm:$0xf]  ;;  %v3454_v61 = vld [vmem:[#allocation13 + $0x94] sm:$0xf] }
  0xef   :  { %1304 = vmatpush.bf16.msra.mxu2 %v2755_v47  ;;  %1317 = vmatpush.bf16.msrb.mxu3 %v2851_v50  ;;  %v3449_v47 = vld [vmem:[#allocation13 + $0x68] sm:$0xf0]  ;;  %v2998_v50 = vld [vmem:[#allocation13 + $0x120] sm:$0xf]  ;;  %v3451_v9 = vld [vmem:[#allocation13 + $0x7c] sm:$0xf] }
  0xf0   :  { %v2928_v0 = vld [vmem:[#allocation13 + $0x9c] sm:$0xf0]  ;;  %v3000_v26 = vld [vmem:[#allocation13 + $0x12c] sm:$0xf0] }
  0xf1   :  { %1284 = vmatpush.bf16.msrb.mxu0 %v2491_v59  ;;  %1297 = vmatpush.bf16.msra.mxu1 %v2587_v60  ;;  %v470_v11 = vpop.f32.mrf.mxu3  ;;  %v2903_v59 = vor.u32 %v3449_v47, %v2902_v46  ;;  %v2999_v60 = vor.u32 %v3473_v52, %v2998_v50  ;;  %v3481_v46 = vld [vmem:[#allocation13 + $0x16c] sm:$0xf]  ;;  %v3036_v47 = vld [vmem:[#allocation13 + $0x174] sm:$0xf0]  ;;  %v3215_v52 = vor.u32 %v3527_v21, %v3214_v32 }
  0xf2   :  { %v471_v8 = vadd.f32 %v470_v11, %v3963_v22  ;;  %v2974_v11 = vld [vmem:[#allocation13 + $0xf0] sm:$0xf]  ;;  %v2892_v32 = vld [vmem:[#allocation13 + $0x54] sm:$0xf0] }
  0xf3   :  { %1305 = vmatpush.bf16.msra.mxu2 %v2743_v4  ;;  %1318 = vmatpush.bf16.msrb.mxu3 %v2839_v58  ;;  %v2682_v4 = vld [vmem:[#allocation11 + $0x1a0] sm:$0xf]  ;;  %v3393_v58 = vld [vmem:[#allocation11 + $0x1a8] sm:$0xf0] }
  0xf4   :  { %v499_v25 = vadd.f32 %v483_v56, %v471_v8  ;;  %v2803_v56 = vor.u32 %v3423_v41, %v2802_v40  ;;  %v2779_v8 = vor.u32 %v3417_v6, %v2778_v5  ;;  %v3437_v40 = vld [vmem:[#allocation13 + $0x8] sm:$0xf0]  ;;  %v2950_v41 = vld [vmem:[#allocation13 + $0xc0] sm:$0xf] }
  0xf5   :  { %1285 = vmatpush.bf16.msrb.mxu0 %v2479_v12  ;;  %1298 = vmatpush.bf16.msra.mxu1 %v2575_v13  ;;  %v3467_v12 = vld [vmem:[#allocation13 + $0xf8] sm:$0xf0]  ;;  %v2683_v13 = vor.u32 %v3393_v58, %v2682_v4  ;;  %v3094_v5 = vld [vmem:[#allocation13 + $0x1e0] sm:$0xf] }
  0xf6   :  { %v507_v22 = vmax.f32 %v499_v25, 0.0  ;;  %v2975_v23 = vor.u32 %v3467_v12, %v2974_v11  ;;  %v3530_v25 = vld [vmem:[#allocation13 + $0x2f0] sm:$0xf0]  ;;  %v3190_v6 = vld [vmem:[#allocation13 + $0x2a0] sm:$0xf] }
  0xf7   :  { %1306 = vmatpush.bf16.msra.mxu2 %v2731_v18  ;;  %1319 = vmatpush.bf16.msrb.mxu3 %v2827_v19  ;;  %v3130_v18 = vld [vmem:[#allocation13 + $0x228] sm:$0xf]  ;;  %v3506_v19 = vld [vmem:[#allocation13 + $0x230] sm:$0xf0]  ;;  %v3227_v30 = vor.u32 %v3530_v25, %v3226_v24  ;;  %v3475_v12 = vld [vmem:[#allocation13 + $0x13c] sm:$0xf] }
  0xf8   :  { %v3996_v38 = vpack.c.bf16 %v507_v22, %v506_v43  ;;  %1286 = vmatmul.bf16.vlgmr.msrb.gmra.mxu0 %v3965_v36  ;;  %1299 = vmatmul.bf16.vlgmr.msra.gmra.mxu1 %v3967_v37  ;;  %v2694_v36 = vld [vmem:[#allocation11 + $0x1b8] sm:$0xf]  ;;  %v3464_v43 = vld [vmem:[#allocation13 + $0xe0] sm:$0xf0]  ;;  %v2916_v11 = vld [vmem:[#allocation13 + $0x84] sm:$0xf0] }
  0xf9   :  { %1995 = vmatpush.bf16.msra.mxu0 %v2939_v15  ;;  %2008 = vmatpush.bf16.msrb.mxu1 %v3035_v2  ;;  %v472_v42 = vpop.f32.mrf.mxu3  ;;  %v2790_v37 = vld [vmem:[#allocation11 + $0x278] sm:$0xf]  ;;  %v2695_v1 = vor.u32 %v3396_v48, %v2694_v36  ;;  %v2670_v15 = vld [vmem:[#allocation11 + $0x188] sm:$0xf]  ;;  %v3390_v2 = vld [vmem:[#allocation11 + $0x190] sm:$0xf0]  ;;  %v2963_v35 = vor.u32 %v3464_v43, %v2962_v28 }
  0xfa   :  { %v2791_v3 = vor.u32 %v3420_v57, %v2790_v37  ;;  %v2671_v22 = vor.u32 %v3390_v2, %v2670_v15  ;;  %v3461_v42 = vld [vmem:[#allocation13 + $0xc8] sm:$0xf0]  ;;  %v3500_v48 = vld [vmem:[#allocation13 + $0x200] sm:$0xf0]  ;;  %v3202_v37 = vld [vmem:[#allocation13 + $0x2b8] sm:$0xf] }
  0xfb   :  { %1307 = vmatpush.bf16.msra.mxu2 %v2719_v51  ;;  %1320 = vmatpush.bf16.msrb.mxu3 %v2815_v31  ;;  %v3118_v51 = vld [vmem:[#allocation13 + $0x210] sm:$0xf]  ;;  %v3503_v31 = vld [vmem:[#allocation13 + $0x218] sm:$0xf0]  ;;  %v2951_v36 = vor.u32 %v3461_v42, %v2950_v41  ;;  %v3524_v57 = vld [vmem:[#allocation13 + $0x2c0] sm:$0xf0] }
  0xfc   :  { %v3119_v50 = vor.u32 %v3503_v31, %v3118_v51  ;;  %v3203_v58 = vor.u32 %v3524_v57, %v3202_v37  ;;  %v3082_v2 = vld [vmem:[#allocation13 + $0x1c8] sm:$0xf]  ;;  %v2904_v24 = vld [vmem:[#allocation13 + $0x6c] sm:$0xf0]  ;;  %v3472_v25 = vld [vmem:[#allocation13 + $0x124] sm:$0xf] }
  0xfd   :  { %1996 = vmatpush.bf16.msra.mxu0 %v2927_v49  ;;  %2009 = vmatpush.bf16.msrb.mxu1 %v3023_v29  ;;  %v2767_v49 = vor.u32 %v3414_v17, %v2766_v16  ;;  %v3131_v29 = vor.u32 %v3506_v19, %v3130_v18  ;;  %v3494_v16 = vld [vmem:[#allocation13 + $0x1d0] sm:$0xf0]  ;;  %v3178_v17 = vld [vmem:[#allocation13 + $0x288] sm:$0xf]  ;;  %v2919_v19 = vor.u32 %v3451_v9, %v2916_v11  ;;  %v3070_v43 = vld [vmem:[#allocation13 + $0x1b0] sm:$0xf] }
  0xfe   :  { %1260 = vmatmul.bf16.vlgmr.msrb.gmra.mxu2 %v3987_v54  ;;  %1273 = vmatmul.bf16.vlgmr.msra.gmra.mxu3 %v3989_v55  ;;  %v3518_v18 = vld [vmem:[#allocation13 + $0x290] sm:$0xf0]  ;;  %v3083_v27 = vor.u32 %v3494_v16, %v3082_v2  ;;  %v3003_v51 = vor.u32 %v3472_v25, %v3000_v26  ;;  %v3445_v31 = vld [vmem:[#allocation13 + $0x4c] sm:$0xf]  ;;  %v3488_v41 = vld [vmem:[#allocation13 + $0x1a0] sm:$0xf0] }
  0xff   :  { %1308 = vmatpush.bf16.msra.mxu2 %v2707_v53  ;;  %1321 = vmatpush.bf16.msrb.mxu3 %v2803_v56  ;;  %v3106_v53 = vld [vmem:[#allocation13 + $0x1f8] sm:$0xf]  ;;  %v2855_v56 = vor.u32 %v3437_v40, %v2854_v39  ;;  %v3179_v28 = vor.u32 %v3518_v18, %v3178_v17  ;;  %v3485_v37 = vld [vmem:[#allocation13 + $0x188] sm:$0xf0]  ;;  %v3142_v57 = vld [vmem:[#allocation13 + $0x240] sm:$0xf] }
 0x100   :  { %v3107_v4 = vor.u32 %v3500_v48, %v3106_v53  ;;  %v3058_v40 = vld [vmem:[#allocation13 + $0x198] sm:$0xf]  ;;  %v2976_v53 = vld [vmem:[#allocation13 + $0xfc] sm:$0xf0]  ;;  %v3502_v11 = vld [vmem:[#allocation13 + $0x214] sm:$0xf] }
 0x101   :  { %1997 = vmatpush.bf16.msra.mxu0 %v2915_v44  ;;  %2010 = vmatpush.bf16.msrb.mxu1 %v3011_v45  ;;  %v3457_v44 = vld [vmem:[#allocation13 + $0xac] sm:$0xf]  ;;  %v2940_v45 = vld [vmem:[#allocation13 + $0xb4] sm:$0xf0]  ;;  %v3046_v48 = vld [vmem:[#allocation13 + $0x180] sm:$0xf] }
 0x102   :  { %v3154_v42 = vld [vmem:[#allocation13 + $0x258] sm:$0xf]  ;;  %v3216_v2 = vld [vmem:[#allocation13 + $0x2dc] sm:$0xf0]  ;;  %v3436_v16 = vld [vmem:[#allocation13 + $0x4] sm:$0xf] }
 0x103   :  { %1309 = vmatpush.bf16.msra.mxu2 %v2695_v1  ;;  %1322 = vmatpush.bf16.msrb.mxu3 %v2791_v3  ;;  %v3478_v1 = vld [vmem:[#allocation13 + $0x154] sm:$0xf]  ;;  %v3024_v3 = vld [vmem:[#allocation13 + $0x15c] sm:$0xf0]  ;;  %v2856_v17 = vld [vmem:[#allocation13 + $0xc] sm:$0xf0] }
 0x104   :  { %v3460_v18 = vld [vmem:[#allocation13 + $0xc4] sm:$0xf]  ;;  %v3483_v25 = vld [vmem:[#allocation13 + $0x178] sm:$0xf0] }
 0x105   :  { %1998 = vmatpush.bf16.msra.mxu0 %v2903_v59  ;;  %2011 = vmatpush.bf16.msrb.mxu1 %v2999_v60  ;;  %v2943_v59 = vor.u32 %v3457_v44, %v2940_v45  ;;  %v3039_v60 = vor.u32 %v3481_v46, %v3036_v47  ;;  %v3512_v44 = vld [vmem:[#allocation13 + $0x260] sm:$0xf0]  ;;  %v2895_v45 = vor.u32 %v3445_v31, %v2892_v32  ;;  %v3442_v47 = vld [vmem:[#allocation13 + $0x34] sm:$0xf] }
 0x107   :  { %1310 = vmatpush.bf16.msra.mxu2 %v2683_v13  ;;  %1323 = vmatpush.bf16.msrb.mxu3 %v2779_v8  ;;  %v3012_v13 = vld [vmem:[#allocation13 + $0x144] sm:$0xf0] }
 0x109   :  { %1999 = vmatpush.bf16.msra.mxu0 %v2891_v7  ;;  %2012 = vmatpush.bf16.msrb.mxu1 %v2987_v34  ;;  %v2931_v7 = vor.u32 %v3454_v61, %v2928_v0  ;;  %v3027_v34 = vor.u32 %v3478_v1, %v3024_v3  ;;  %v3132_v61 = vld [vmem:[#allocation13 + $0x234] sm:$0xf0]  ;;  %v3529_v0 = vld [vmem:[#allocation13 + $0x2ec] sm:$0xf]  ;;  %v3439_v3 = vld [vmem:[#allocation13 + $0x1c] sm:$0xf] }
 0x10a   :  { %v3228_v1 = vld [vmem:[#allocation13 + $0x2f4] sm:$0xf0] }
 0x10b   :  { %1311 = vmatpush.bf16.msra.mxu2 %v2671_v22  ;;  %1324 = vmatpush.bf16.msrb.mxu3 %v2767_v49  ;;  %v3491_v22 = vld [vmem:[#allocation13 + $0x1b8] sm:$0xf0]  ;;  %v3166_v49 = vld [vmem:[#allocation13 + $0x270] sm:$0xf]  ;;  %v3231_v9 = vor.u32 %v3529_v0, %v3228_v1  ;;  %v2910_v0 = vld [vmem:[#allocation13 + $0x68] sm:$0xf] }
 0x10c   :  { %v3071_v21 = vor.u32 %v3491_v22, %v3070_v43  ;;  %v3499_v43 = vld [vmem:[#allocation13 + $0x1fc] sm:$0xf]  ;;  %v2859_v22 = vor.u32 %v3436_v16, %v2856_v17  ;;  %v3450_v1 = vld [vmem:[#allocation13 + $0x70] sm:$0xf0]  ;;  %v3060_v17 = vld [vmem:[#allocation13 + $0x1a4] sm:$0xf0] }
 0x10d   :  { %2000 = vmatpush.bf16.msra.mxu0 %v2879_v20  ;;  %2013 = vmatpush.bf16.msrb.mxu1 %v2975_v23  ;;  %v3015_v20 = vor.u32 %v3475_v12, %v3012_v13  ;;  %v3448_v23 = vld [vmem:[#allocation13 + $0x64] sm:$0xf]  ;;  %v3120_v12 = vld [vmem:[#allocation13 + $0x21c] sm:$0xf0]  ;;  %v3526_v13 = vld [vmem:[#allocation13 + $0x2d4] sm:$0xf] }
 0x10e   :  { %1312 = vmatmul.bf16.vlgmr.msra.gmra.mxu2 %v3987_v54  ;;  %1325 = vmatmul.bf16.vlgmr.msrb.gmra.mxu3 %v3989_v55  ;;  %v3497_v54 = vld [vmem:[#allocation13 + $0x1e8] sm:$0xf0]  ;;  %v3487_v16 = vld [vmem:[#allocation13 + $0x19c] sm:$0xf] }
 0x10f   :  { %2021 = vmatpush.bf16.msrb.mxu2 %v3131_v29  ;;  %2034 = vmatpush.bf16.msra.mxu3 %v3227_v30  ;;  %v3521_v55 = vld [vmem:[#allocation13 + $0x2a8] sm:$0xf0]  ;;  %v3095_v8 = vor.u32 %v3497_v54, %v3094_v5  ;;  %v3515_v29 = vld [vmem:[#allocation13 + $0x278] sm:$0xf0]  ;;  %v2907_v30 = vor.u32 %v3448_v23, %v2904_v24  ;;  %v2964_v5 = vld [vmem:[#allocation13 + $0xe4] sm:$0xf0]  ;;  %v1473_v54 = vunpack.c.l.b16 %v3996_v38 }
 0x110   :  { %v3191_v15 = vor.u32 %v3521_v55, %v3190_v6  ;;  %v3167_v39 = vor.u32 %v3515_v29, %v3166_v49  ;;  %v3047_v6 = vor.u32 %v3485_v37, %v3046_v48  ;;  %v3042_v24 = vld [vmem:[#allocation13 + $0x170] sm:$0xf]  ;;  %v3108_v29 = vld [vmem:[#allocation13 + $0x204] sm:$0xf0] }
 0x111   :  { %2001 = vmatpush.bf16.msra.mxu0 %v2867_v33  ;;  %2014 = vmatpush.bf16.msrb.mxu1 %v2963_v35  ;;  %v3469_v33 = vld [vmem:[#allocation13 + $0x10c] sm:$0xf]  ;;  %v2988_v35 = vld [vmem:[#allocation13 + $0x114] sm:$0xf0]  ;;  %v4014_v23 = vpack.c.b16 %v1473_v54, %v1473_v54  ;;  %v3043_v32 = vor.u32 %v3483_v25, %v3042_v24  ;;  %v3490_v54 = vld [vmem:[#allocation13 + $0x1b4] sm:$0xf] }
 0x112   :  { %v2991_v46 = vor.u32 %v3469_v33, %v2988_v35  ;;  %v2934_v33 = vld [vmem:[#allocation13 + $0x98] sm:$0xf]  ;;  %v3456_v35 = vld [vmem:[#allocation13 + $0xa0] sm:$0xf0] }
 0x113   :  { %2022 = vmatpush.bf16.msrb.mxu2 %v3119_v50  ;;  %2035 = vmatpush.bf16.msra.mxu3 %v3215_v52  ;;  %v2880_v50 = vld [vmem:[#allocation13 + $0x3c] sm:$0xf0]  ;;  %v3466_v52 = vld [vmem:[#allocation13 + $0xf4] sm:$0xf]  ;;  %v2886_v24 = vld [vmem:[#allocation13 + $0x38] sm:$0xf] }
 0x114   :  { %v2883_v62 = vor.u32 %v3442_v47, %v2880_v50  ;;  %v2979_v63 = vor.u32 %v3466_v52, %v2976_v53  ;;  %v2935_v47 = vor.u32 %v3456_v35, %v2934_v33  ;;  %v2922_v52 = vld [vmem:[#allocation13 + $0x80] sm:$0xf]  ;;  %v3453_v53 = vld [vmem:[#allocation13 + $0x88] sm:$0xf0]  ;;  %v3444_v25 = vld [vmem:[#allocation13 + $0x40] sm:$0xf0] }
 0x115   :  { %2002 = vmatpush.bf16.msra.mxu0 %v2855_v56  ;;  %2015 = vmatpush.bf16.msrb.mxu1 %v2951_v36  ;;  %v3059_v56 = vor.u32 %v3488_v41, %v3058_v40  ;;  %v3155_v36 = vor.u32 %v3512_v44, %v3154_v42  ;;  %v3111_v40 = vor.u32 %v3499_v43, %v3108_v29  ;;  %v3496_v42 = vld [vmem:[#allocation13 + $0x1e4] sm:$0xf]  ;;  %v3096_v44 = vld [vmem:[#allocation13 + $0x1ec] sm:$0xf0] }
 0x116   :  { %v3099_v48 = vor.u32 %v3496_v42, %v3096_v44  ;;  %v3063_v43 = vor.u32 %v3487_v16, %v3060_v17  ;;  %v3048_v29 = vld [vmem:[#allocation13 + $0x18c] sm:$0xf0]  ;;  %v2887_v33 = vor.u32 %v3444_v25, %v2886_v24  ;;  %v2970_v42 = vld [vmem:[#allocation13 + $0xe0] sm:$0xf]  ;;  %v3465_v44 = vld [vmem:[#allocation13 + $0xe8] sm:$0xf0] }
 0x117   :  { %2023 = vmatpush.bf16.msrb.mxu2 %v3107_v4  ;;  %2036 = vmatpush.bf16.msra.mxu3 %v3203_v58  ;;  %v2868_v4 = vld [vmem:[#allocation13 + $0x24] sm:$0xf0]  ;;  %v3463_v58 = vld [vmem:[#allocation13 + $0xdc] sm:$0xf]  ;;  %v3174_v24 = vld [vmem:[#allocation13 + $0x278] sm:$0xf] }
 0x118   :  { %2003 = vmatmul.bf16.vlgmr.msra.gmra.mxu0 %v4006_v10  ;;  %2016 = vmatmul.bf16.vlgmr.msrb.gmra.mxu1 %v4008_v14  ;;  %v3519_v16 = vld [vmem:[#allocation13 + $0x298] sm:$0xf0]  ;;  %v3516_v25 = vld [vmem:[#allocation13 + $0x280] sm:$0xf0] }
 0x119   :  { %2047 = vmatpush.bf16.msrb.mxu0 %v2943_v59  ;;  %2060 = vmatpush.bf16.msra.mxu1 %v3039_v60  ;;  %v3509_v59 = vld [vmem:[#allocation13 + $0x248] sm:$0xf0] }
 0x11a   :  { %v3505_v60 = vld [vmem:[#allocation13 + $0x22c] sm:$0xf]  ;;  %v3143_v55 = vor.u32 %v3509_v59, %v3142_v57  ;;  %v3084_v59 = vld [vmem:[#allocation13 + $0x1d4] sm:$0xf0] }
 0x11b   :  { %2024 = vmatpush.bf16.msrb.mxu2 %v3095_v8  ;;  %2037 = vmatpush.bf16.msra.mxu3 %v3191_v15  ;;  %v2871_v8 = vor.u32 %v3439_v3, %v2868_v4  ;;  %v2967_v15 = vor.u32 %v3463_v58, %v2964_v5  ;;  %v3493_v57 = vld [vmem:[#allocation13 + $0x1cc] sm:$0xf]  ;;  %v3006_v3 = vld [vmem:[#allocation13 + $0x128] sm:$0xf]  ;;  %v3474_v4 = vld [vmem:[#allocation13 + $0x130] sm:$0xf0] }
 0x11c   :  { %v3087_v58 = vor.u32 %v3493_v57, %v3084_v59  ;;  %v2862_v57 = vld [vmem:[#allocation13 + $0x8] sm:$0xf]  ;;  %v3438_v59 = vld [vmem:[#allocation13 + $0x10] sm:$0xf0] }
 0x11d   :  { %2048 = vmatpush.bf16.msrb.mxu0 %v2931_v7  ;;  %2061 = vmatpush.bf16.msra.mxu1 %v3027_v34  ;;  %v1474_v7 = vunpack.c.h.b16 %v3996_v38  ;;  %v3135_v34 = vor.u32 %v3505_v60, %v3132_v61  ;;  %v3459_v38 = vld [vmem:[#allocation13 + $0xb8] sm:$0xf0]  ;;  %v3517_v60 = vld [vmem:[#allocation13 + $0x28c] sm:$0xf]  ;;  %v3180_v61 = vld [vmem:[#allocation13 + $0x294] sm:$0xf0] }
 0x11e   :  { %v3183_v5 = vor.u32 %v3517_v60, %v3180_v61  ;;  %v2958_v60 = vld [vmem:[#allocation13 + $0xc8] sm:$0xf]  ;;  %v3462_v61 = vld [vmem:[#allocation13 + $0xd0] sm:$0xf0] }
 0x11f   :  { %2025 = vmatpush.bf16.msrb.mxu2 %v3083_v27  ;;  %2038 = vmatpush.bf16.msra.mxu3 %v3179_v28  ;;  %v4016_v26 = vpack.c.b16 %v1474_v7, %v1474_v7  ;;  %v3123_v27 = vor.u32 %v3502_v11, %v3120_v12  ;;  %v3219_v28 = vor.u32 %v3526_v13, %v3216_v2  ;;  %v3168_v7 = vld [vmem:[#allocation13 + $0x27c] sm:$0xf0]  ;;  %v2898_v11 = vld [vmem:[#allocation13 + $0x50] sm:$0xf]  ;;  %v3447_v12 = vld [vmem:[#allocation13 + $0x58] sm:$0xf0] }
 0x120   :  { %v2994_v13 = vld [vmem:[#allocation13 + $0x110] sm:$0xf] }
 0x121   :  { %2049 = vmatpush.bf16.msrb.mxu0 %v2919_v19  ;;  %2062 = vmatpush.bf16.msra.mxu1 %v3015_v20  ;;  %v2952_v19 = vld [vmem:[#allocation13 + $0xcc] sm:$0xf0] }
 0x122   :  { %v2946_v20 = vld [vmem:[#allocation13 + $0xb0] sm:$0xf]  ;;  %v2955_v49 = vor.u32 %v3460_v18, %v2952_v19  ;;  %v3511_v18 = vld [vmem:[#allocation13 + $0x25c] sm:$0xf]  ;;  %v3156_v19 = vld [vmem:[#allocation13 + $0x264] sm:$0xf0] }
 0x123   :  { %2026 = vmatpush.bf16.msrb.mxu2 %v3071_v21  ;;  %2039 = vmatpush.bf16.msra.mxu3 %v3167_v39  ;;  %v2947_v31 = vor.u32 %v3459_v38, %v2946_v20  ;;  %v3030_v21 = vld [vmem:[#allocation13 + $0x158] sm:$0xf]  ;;  %v3480_v39 = vld [vmem:[#allocation13 + $0x160] sm:$0xf0]  ;;  %v2899_v20 = vor.u32 %v3447_v12, %v2898_v11 }
 0x124   :  { %v3031_v50 = vor.u32 %v3480_v39, %v3030_v21  ;;  %v3234_v21 = vld [vmem:[#allocation13 + $0x2f0] sm:$0xf]  ;;  %v3531_v39 = vld [vmem:[#allocation13 + $0x2f8] sm:$0xf0] }
 0x125   :  { %2050 = vmatpush.bf16.msrb.mxu0 %v2907_v30  ;;  %2063 = vmatpush.bf16.msra.mxu1 %v3003_v51  ;;  %v3523_v30 = vld [vmem:[#allocation13 + $0x2bc] sm:$0xf]  ;;  %v3204_v51 = vld [vmem:[#allocation13 + $0x2c4] sm:$0xf0] }
 0x126   :  { %v3207_v41 = vor.u32 %v3523_v30, %v3204_v51  ;;  %v3508_v30 = vld [vmem:[#allocation13 + $0x244] sm:$0xf]  ;;  %v3144_v51 = vld [vmem:[#allocation13 + $0x24c] sm:$0xf0] }
 0x127   :  { %2027 = vmatpush.bf16.msrb.mxu2 %v3059_v56  ;;  %2040 = vmatpush.bf16.msra.mxu3 %v3155_v36  ;;  %v3018_v56 = vld [vmem:[#allocation13 + $0x140] sm:$0xf]  ;;  %v3477_v36 = vld [vmem:[#allocation13 + $0x148] sm:$0xf0] }
 0x129   :  { %2051 = vmatpush.bf16.msrb.mxu0 %v2895_v45  ;;  %2064 = vmatpush.bf16.msra.mxu1 %v2991_v46  ;;  %v3520_v45 = vld [vmem:[#allocation13 + $0x2a4] sm:$0xf]  ;;  %v3192_v46 = vld [vmem:[#allocation13 + $0x2ac] sm:$0xf0] }
 0x12a   :  { %v3195_v37 = vor.u32 %v3520_v45, %v3192_v46  ;;  %v3147_v46 = vor.u32 %v3508_v30, %v3144_v51  ;;  %v3162_v30 = vld [vmem:[#allocation13 + $0x260] sm:$0xf]  ;;  %v3513_v51 = vld [vmem:[#allocation13 + $0x268] sm:$0xf0] }
 0x12b   :  { %2028 = vmatpush.bf16.msrb.mxu2 %v3047_v6  ;;  %2041 = vmatpush.bf16.msra.mxu3 %v3143_v55  ;;  %v3072_v6 = vld [vmem:[#allocation13 + $0x1bc] sm:$0xf0]  ;;  %v3514_v55 = vld [vmem:[#allocation13 + $0x274] sm:$0xf] }
 0x12c   :  { %v3171_v2 = vor.u32 %v3514_v55, %v3168_v7  ;;  %v3102_v55 = vld [vmem:[#allocation13 + $0x1e8] sm:$0xf]  ;;  %v3498_v7 = vld [vmem:[#allocation13 + $0x1f0] sm:$0xf0] }
 0x12d   :  { %2052 = vmatpush.bf16.msrb.mxu0 %v2883_v62  ;;  %2065 = vmatpush.bf16.msra.mxu1 %v2979_v63  ;;  %v2923_v62 = vor.u32 %v3453_v53, %v2922_v52  ;;  %v3019_v63 = vor.u32 %v3477_v36, %v3018_v56  ;;  %v3126_v52 = vld [vmem:[#allocation13 + $0x218] sm:$0xf]  ;;  %v3504_v53 = vld [vmem:[#allocation13 + $0x220] sm:$0xf0]  ;;  %v2971_v36 = vor.u32 %v3465_v44, %v2970_v42 }
 0x12e   :  { %2029 = vmatmul.bf16.vlgmr.msrb.gmra.mxu2 %v4014_v23  ;;  %2042 = vmatmul.bf16.vlgmr.msra.gmra.mxu3 %v4016_v26  ;;  %v3103_v11 = vor.u32 %v3498_v7, %v3102_v55 }
 0x12f   :  { %2073 = vmatpush.bf16.msra.mxu2 %v3135_v34  ;;  %2086 = vmatpush.bf16.msrb.mxu3 %v3231_v9  ;;  %v2911_v34 = vor.u32 %v3450_v1, %v2910_v0  ;;  %v3007_v9 = vor.u32 %v3474_v4, %v3006_v3  ;;  %v3114_v0 = vld [vmem:[#allocation13 + $0x200] sm:$0xf]  ;;  %v2863_v1 = vor.u32 %v3438_v59, %v2862_v57  ;;  %v3501_v4 = vld [vmem:[#allocation13 + $0x208] sm:$0xf0] }
 0x130   :  { %v2959_v3 = vor.u32 %v3462_v61, %v2958_v60 }
 0x131   :  { %2053 = vmatpush.bf16.msrb.mxu0 %v2871_v8  ;;  %2066 = vmatpush.bf16.msra.mxu1 %v2967_v15  ;;  %v3471_v8 = vld [vmem:[#allocation13 + $0x118] sm:$0xf0]  ;;  %v3075_v15 = vor.u32 %v3490_v54, %v3072_v6  ;;  %v3115_v54 = vor.u32 %v3501_v4, %v3114_v0 }
 0x132   :  { %v2995_v38 = vor.u32 %v3471_v8, %v2994_v13  ;;  %v640_v13 = vld [vmem:[%s4055_s6] sm:$0x7]  ;;  %v3090_v8 = vld [vmem:[#allocation13 + $0x1d0] sm:$0xf] }
 0x133   :  { %2074 = vmatpush.bf16.msra.mxu2 %v3123_v27  ;;  %2087 = vmatpush.bf16.msrb.mxu3 %v3219_v28  ;;  %v2982_v27 = vld [vmem:[#allocation13 + $0xf8] sm:$0xf]  ;;  %v3468_v28 = vld [vmem:[#allocation13 + $0x100] sm:$0xf0]  ;;  %v642_v17 = vperm.slane %v640_v13, 0  ;;  %v644_v57 = vperm.slane %v640_v13, 2 }
 0x134   :  { %v2983_v35 = vor.u32 %v3468_v28, %v2982_v27 }
 0x135   :  { %2054 = vmatpush.bf16.msrb.mxu0 %v2859_v22  ;;  %2067 = vmatpush.bf16.msra.mxu1 %v2955_v49  ;;  %v3159_v22 = vor.u32 %v3511_v18, %v3156_v19  ;;  %v3484_v49 = vld [vmem:[#allocation13 + $0x184] sm:$0xf] }
 0x136   :  { %v3051_v45 = vor.u32 %v3484_v49, %v3048_v29  ;;  %v3489_v29 = vld [vmem:[#allocation13 + $0x1a8] sm:$0xf0] }
 0x137   :  { %2075 = vmatpush.bf16.msra.mxu2 %v3111_v40  ;;  %2088 = vmatpush.bf16.msrb.mxu3 %v3207_v41  ;;  %v2874_v40 = vld [vmem:[#allocation13 + $0x20] sm:$0xf]  ;;  %v3441_v41 = vld [vmem:[#allocation13 + $0x28] sm:$0xf0] }
 0x138   :  { %2055 = vmatmul.bf16.vlgmr.msrb.gmra.mxu0 %v4006_v10  ;;  %2068 = vmatmul.bf16.vlgmr.msra.gmra.mxu1 %v4008_v14  ;;  %v2875_v56 = vor.u32 %v3441_v41, %v2874_v40 }
 0x139   :  { %2099 = vmatpush.bf16.msra.mxu0 %v2947_v31  ;;  %2112 = vmatpush.bf16.msrb.mxu1 %v3043_v32  ;;  %v3138_v31 = vld [vmem:[#allocation13 + $0x230] sm:$0xf]  ;;  %v3507_v32 = vld [vmem:[#allocation13 + $0x238] sm:$0xf0] }
 0x13b   :  { %2076 = vmatpush.bf16.msra.mxu2 %v3099_v48  ;;  %2089 = vmatpush.bf16.msrb.mxu3 %v3195_v37  ;;  %v3222_v48 = vld [vmem:[#allocation13 + $0x2d8] sm:$0xf]  ;;  %v3528_v37 = vld [vmem:[#allocation13 + $0x2e0] sm:$0xf0] }
 0x13d   :  { %2100 = vmatpush.bf16.msra.mxu0 %v2935_v47  ;;  %2113 = vmatpush.bf16.msrb.mxu1 %v3031_v50  ;;  %v3139_v47 = vor.u32 %v3507_v32, %v3138_v31  ;;  %v3235_v50 = vor.u32 %v3531_v39, %v3234_v21  ;;  %v3163_v32 = vor.u32 %v3513_v51, %v3162_v30  ;;  %v3150_v21 = vld [vmem:[#allocation13 + $0x248] sm:$0xf]  ;;  %v3510_v39 = vld [vmem:[#allocation13 + $0x250] sm:$0xf0] }
 0x13e   :  { %v3151_v44 = vor.u32 %v3510_v39, %v3150_v21  ;;  %v3541_v51 = vld [vmem:[#allocation14 + $0x48] sm:$0xff] }
 0x13f   :  { %2077 = vmatpush.bf16.msra.mxu2 %v3087_v58  ;;  %2090 = vmatpush.bf16.msrb.mxu3 %v3183_v5  ;;  %v3210_v58 = vld [vmem:[#allocation13 + $0x2c0] sm:$0xf]  ;;  %v3525_v5 = vld [vmem:[#allocation13 + $0x2c8] sm:$0xf0] }
 0x140   :  { %v3211_v6 = vor.u32 %v3525_v5, %v3210_v58  ;;  %v3537_v58 = vld [vmem:[#allocation14 + $0x28] sm:$0xff]  ;;  %v3536_v5 = vld [vmem:[#allocation14 + $0x20] sm:$0xff] }
 0x141   :  { %2101 = vmatpush.bf16.msra.mxu0 %v2923_v62  ;;  %2114 = vmatpush.bf16.msrb.mxu1 %v3019_v63  ;;  %v3127_v62 = vor.u32 %v3504_v53, %v3126_v52  ;;  %v3223_v63 = vor.u32 %v3528_v37, %v3222_v48 }
 0x143   :  { %2078 = vmatpush.bf16.msra.mxu2 %v3075_v15  ;;  %2091 = vmatpush.bf16.msrb.mxu3 %v3171_v2  ;;  %v3495_v15 = vld [vmem:[#allocation13 + $0x1d8] sm:$0xf0]  ;;  %v3186_v2 = vld [vmem:[#allocation13 + $0x290] sm:$0xf] }
 0x144   :  { %v3091_v18 = vor.u32 %v3495_v15, %v3090_v8  ;;  %v3187_v19 = vor.u32 %v3519_v16, %v3186_v2 }
 0x145   :  { %2102 = vmatpush.bf16.msra.mxu0 %v2911_v34  ;;  %2115 = vmatpush.bf16.msrb.mxu1 %v3007_v9  ;;  %v3198_v34 = vld [vmem:[#allocation13 + $0x2a8] sm:$0xf]  ;;  %v3522_v9 = vld [vmem:[#allocation13 + $0x2b0] sm:$0xf0] }
 0x146   :  { %v3199_v12 = vor.u32 %v3522_v9, %v3198_v34  ;;  %v3535_v34 = vld [vmem:[#allocation14 + $0x18] sm:$0xff]  ;;  %v3534_v9 = vld [vmem:[#allocation14 + $0x10] sm:$0xff] }
 0x147   :  { %2079 = vmatpush.bf16.msra.mxu2 %v3063_v43  ;;  %2092 = vmatpush.bf16.msrb.mxu3 %v3159_v22  ;;  %v3175_v22 = vor.u32 %v3516_v25, %v3174_v24 }
 0x149   :  { %2103 = vmatpush.bf16.msra.mxu0 %v2899_v20  ;;  %2116 = vmatpush.bf16.msrb.mxu1 %v2995_v38  ;;  %v3078_v20 = vld [vmem:[#allocation13 + $0x1b8] sm:$0xf]  ;;  %v3492_v38 = vld [vmem:[#allocation13 + $0x1c0] sm:$0xf0] }
 0x14b   :  { %2080 = vmatpush.bf16.msra.mxu2 %v3051_v45  ;;  %2093 = vmatpush.bf16.msrb.mxu3 %v3147_v46  ;;  %v643_v45 = vperm.slane %v640_v13, 1  ;;  %v3533_v13 = vld [vmem:[#allocation14 + $0x8] sm:$0xff] }
 0x14d   :  { %2104 = vmatpush.bf16.msra.mxu0 %v2887_v33  ;;  %2117 = vmatpush.bf16.msrb.mxu1 %v2983_v35  ;;  %v3054_v33 = vld [vmem:[#allocation13 + $0x188] sm:$0xf]  ;;  %v3486_v35 = vld [vmem:[#allocation13 + $0x190] sm:$0xf0] }
 0x14e   :  { %2081 = vmatmul.bf16.vlgmr.msra.gmra.mxu2 %v4014_v23  ;;  %2094 = vmatmul.bf16.vlgmr.msrb.gmra.mxu3 %v4016_v26  ;;  %v3055_v42 = vor.u32 %v3486_v35, %v3054_v33 }
 0x14f   :  { %2125 = vmatpush.bf16.msrb.mxu2 %v3139_v47  ;;  %2138 = vmatpush.bf16.msra.mxu3 %v3235_v50 }
 0x151   :  { %2105 = vmatpush.bf16.msra.mxu0 %v2875_v56  ;;  %2118 = vmatpush.bf16.msrb.mxu1 %v2971_v36 }
 0x153   :  { %2126 = vmatpush.bf16.msrb.mxu2 %v3127_v62  ;;  %2139 = vmatpush.bf16.msra.mxu3 %v3223_v63  ;;  %v3539_v63 = vld [vmem:[#allocation14 + $0x38] sm:$0xff] }
 0x155   :  { %2106 = vmatpush.bf16.msra.mxu0 %v2863_v1  ;;  %2119 = vmatpush.bf16.msrb.mxu1 %v2959_v3  ;;  %v1183_v27 = vpop.f32.mrf.mxu0  ;;  %v1196_v28 = vpop.f32.mrf.mxu1 }
 0x156   :  { %v1184_v43 = vadd.f32 %v1183_v27, %v642_v17  ;;  %v3545_v27 = vld [vmem:[#allocation14 + $0x68] sm:$0xff] }
 0x157   :  { %2127 = vmatpush.bf16.msrb.mxu2 %v3115_v54  ;;  %2140 = vmatpush.bf16.msra.mxu3 %v3211_v6 }
 0x158   :  { %2107 = vmatmul.bf16.vlgmr.msra.gmra.mxu0 %v4006_v10  ;;  %2120 = vmatmul.bf16.vlgmr.msrb.gmra.mxu1 %v4008_v14  ;;  %v3079_v10 = vor.u32 %v3492_v38, %v3078_v20  ;;  %v3066_v14 = vld [vmem:[#allocation13 + $0x1a0] sm:$0xf]  ;;  %v1197_v49 = vadd.f32 %v1196_v28, %v1184_v43  ;;  %v3546_v38 = vld [vmem:[#allocation14 + $0x70] sm:$0xff] }
 0x159   :  { %v3067_v31 = vor.u32 %v3489_v29, %v3066_v14  ;;  %2353 = vmatpush.bf16.msrb.mxu0 %v3539_v63  ;;  %v1461_v14 = vld [vmem:[%s4057_s8] sm:$0x7]  ;;  %v3542_v29 = vld [vmem:[#allocation14 + $0x50] sm:$0xff] }
 0x15b   :  { %2128 = vmatpush.bf16.msrb.mxu2 %v3103_v11  ;;  %2141 = vmatpush.bf16.msra.mxu3 %v3199_v12 }
 0x15d   :  { %v1185_v40 = vpop.f32.mrf.mxu0  ;;  %v1198_v41 = vpop.f32.mrf.mxu1 }
 0x15e   :  { %v3540_v40 = vld [vmem:[#allocation14 + $0x40] sm:$0xff]  ;;  %v3555_v41 = vld [vmem:[#allocation14 + $0xb8] sm:$0xff] }
 0x15f   :  { %2129 = vmatpush.bf16.msrb.mxu2 %v3091_v18  ;;  %2142 = vmatpush.bf16.msra.mxu3 %v3187_v19  ;;  %v3532_v18 = vld [vmem:[#allocation14] sm:$0xff]  ;;  %v3547_v19 = vld [vmem:[#allocation14 + $0x78] sm:$0xff] }
 0x160   :  { %2367 = vmatpush.bf16.msra.mxu1 %v3547_v19 }
 0x163   :  { %2130 = vmatpush.bf16.msrb.mxu2 %v3079_v10  ;;  %2143 = vmatpush.bf16.msra.mxu3 %v3175_v22  ;;  %v3544_v10 = vld [vmem:[#allocation14 + $0x60] sm:$0xff]  ;;  %v3543_v22 = vld [vmem:[#allocation14 + $0x58] sm:$0xff] }
 0x164   :  { %2368 = vmatpush.bf16.msra.mxu1 %v3546_v38 }
 0x165   :  { %v1235_v46 = vpop.f32.mrf.mxu0  ;;  %v1248_v47 = vpop.f32.mrf.mxu1 }
 0x166   :  { %v1236_v50 = vadd.f32 %v1235_v46, %v643_v45  ;;  %v3554_v46 = vld [vmem:[#allocation14 + $0xb0] sm:$0xff] }
 0x167   :  { %2131 = vmatpush.bf16.msrb.mxu2 %v3067_v31  ;;  %2144 = vmatpush.bf16.msra.mxu3 %v3163_v32 }
 0x168   :  { %v1249_v52 = vadd.f32 %v1248_v47, %v1236_v50  ;;  %2369 = vmatpush.bf16.msra.mxu1 %v3545_v27 }
 0x16b   :  { %2132 = vmatpush.bf16.msrb.mxu2 %v3055_v42  ;;  %2145 = vmatpush.bf16.msra.mxu3 %v3151_v44 }
 0x16c   :  { %2370 = vmatpush.bf16.msra.mxu1 %v3544_v10 }
 0x16d   :  { %v1237_v53 = vpop.f32.mrf.mxu0  ;;  %v1250_v56 = vpop.f32.mrf.mxu1 }
 0x16e   :  { %2133 = vmatmul.bf16.vlgmr.msrb.gmra.mxu2 %v4014_v23  ;;  %2146 = vmatmul.bf16.vlgmr.msra.gmra.mxu3 %v4016_v26  ;;  %v3538_v23 = vld [vmem:[#allocation14 + $0x30] sm:$0xff]  ;;  %v3553_v53 = vld [vmem:[#allocation14 + $0xa8] sm:$0xff] }
 0x16f   :  { %2354 = vmatpush.bf16.msrb.mxu0 %v3538_v23  ;;  %2381 = vmatpush.bf16.msra.mxu2 %v3555_v41 }
 0x170   :  { %2371 = vmatpush.bf16.msra.mxu1 %v3543_v22 }
 0x171   :  { %v1209_v36 = vpop.f32.mrf.mxu2  ;;  %v1222_v48 = vpop.f32.mrf.mxu3 }
 0x172   :  { %v1210_v37 = vadd.f32 %v1209_v36, %v1197_v49  ;;  %v1463_v49 = vperm.slane %v1461_v14, 0 }
 0x173   :  { %2355 = vmatpush.bf16.msrb.mxu0 %v3537_v58  ;;  %2382 = vmatpush.bf16.msra.mxu2 %v3554_v46 }
 0x174   :  { %v4031_v59 = vadd.f32 %v1222_v48, %v1210_v37  ;;  %2372 = vmatpush.bf16.msra.mxu1 %v3542_v29  ;;  %v3552_v48 = vld [vmem:[#allocation14 + $0xa0] sm:$0xff]  ;;  %v3551_v37 = vld [vmem:[#allocation14 + $0x98] sm:$0xff] }
 0x175   :  { %v1287_v60 = vpop.f32.mrf.mxu0  ;;  %v1300_v61 = vpop.f32.mrf.mxu1 }
 0x176   :  { %v1288_v62 = vadd.f32 %v1287_v60, %v644_v57  ;;  %v1330_v44 = vmax.f32 %v4031_v59, 0.0  ;;  %v1464_v57 = vperm.slane %v1461_v14, 1  ;;  %v3550_v60 = vld [vmem:[#allocation14 + $0x90] sm:$0xff]  ;;  %v3549_v59 = vld [vmem:[#allocation14 + $0x88] sm:$0xff] }
 0x177   :  { %2356 = vmatpush.bf16.msrb.mxu0 %v3536_v5  ;;  %2383 = vmatpush.bf16.msra.mxu2 %v3553_v53 }
 0x178   :  { %v1301_v0 = vadd.f32 %v1300_v61, %v1288_v62  ;;  %2373 = vmatpush.bf16.msra.mxu1 %v3541_v51 }
 0x179   :  { %v1211_v1 = vpop.f32.mrf.mxu2  ;;  %v1224_v3 = vpop.f32.mrf.mxu3 }
 0x17b   :  { %2357 = vmatpush.bf16.msrb.mxu0 %v3535_v34  ;;  %2384 = vmatpush.bf16.msra.mxu2 %v3552_v48 }
 0x17c   :  { %2374 = vmatpush.bf16.msra.mxu1 %v3540_v40 }
 0x17d   :  { %v1289_v26 = vpop.f32.mrf.mxu0  ;;  %v1302_v4 = vpop.f32.mrf.mxu1 }
 0x17e   :  { %v3548_v26 = vld [vmem:[#allocation14 + $0x80] sm:$0xff] }
 0x17f   :  { %2358 = vmatpush.bf16.msrb.mxu0 %v3534_v9  ;;  %2385 = vmatpush.bf16.msra.mxu2 %v3551_v37 }
 0x181   :  { %v1261_v54 = vpop.f32.mrf.mxu2  ;;  %v1274_v6 = vpop.f32.mrf.mxu3 }
 0x182   :  { %v1262_v55 = vadd.f32 %v1261_v54, %v1249_v52 }
 0x183   :  { %2359 = vmatpush.bf16.msrb.mxu0 %v3533_v13  ;;  %2386 = vmatpush.bf16.msra.mxu2 %v3550_v60 }
 0x184   :  { %v4033_v7 = vadd.f32 %v1274_v6, %v1262_v55 }
 0x186   :  { %v1331_v58 = vmax.f32 %v4033_v7, 0.0 }
 0x187   :  { %2360 = vmatpush.bf16.msrb.mxu0 %v3532_v18  ;;  %2387 = vmatpush.bf16.msra.mxu2 %v3549_v59 }
 0x189   :  { %v1263_v11 = vpop.f32.mrf.mxu2  ;;  %v1276_v12 = vpop.f32.mrf.mxu3 }
 0x18a   :  { %v1465_v11 = vperm.slane %v1461_v14, 2 }
 0x18b   :  { %2388 = vmatpush.bf16.msra.mxu2 %v3548_v26 }
 0x191   :  { %v1313_v8 = vpop.f32.mrf.mxu2  ;;  %v1326_v15 = vpop.f32.mrf.mxu3 }
 0x192   :  { %v1314_v2 = vadd.f32 %v1313_v8, %v1301_v0 }
 0x194   :  { %v4035_v20 = vadd.f32 %v1326_v15, %v1314_v2 }
 0x195   :  { %v2004_v16 = vpop.f32.mrf.mxu0  ;;  %v2017_v17 = vpop.f32.mrf.mxu1 }
 0x196   :  { %v2005_v30 = vadd.f32 %v2004_v16, %v1463_v49 }
 0x198   :  { %v2018_v31 = vadd.f32 %v2017_v17, %v2005_v30  ;;  %v1332_v17 = vmax.f32 %v4035_v20, 0.0 }
 0x199   :  { %v1315_v24 = vpop.f32.mrf.mxu2  ;;  %v1328_v25 = vpop.f32.mrf.mxu3 }
 0x19a   :  { %v3573_v25 = vld [vmem:[%s4059_s10] ss:$0 sm:$0xff]  ;;  %s3817_s10 = smov 128  }
 0x19d   :  { %v2006_v28 = vpop.f32.mrf.mxu0  ;;  %v2019_v43 = vpop.f32.mrf.mxu1 }
 0x1b1   :  { %v2030_v32 = vpop.f32.mrf.mxu2  ;;  %v2043_v33 = vpop.f32.mrf.mxu3 }
 0x1b2   :  { %v2031_v35 = vadd.f32 %v2030_v32, %v2018_v31 }
 0x1b4   :  { %v2044_v42 = vadd.f32 %v2043_v33, %v2031_v35 }
 0x1b5   :  { %v2056_v21 = vpop.f32.mrf.mxu0  ;;  %v2069_v39 = vpop.f32.mrf.mxu1 }
 0x1b6   :  { %v2151_v45 = vmax.f32 %v2044_v42, 0.0  ;;  %v2057_v61 = vadd.f32 %v2056_v21, %v1464_v57 }
 0x1b8   :  { %v2154_v47 = vpack.c.bf16 %v2151_v45, %v1330_v44  ;;  %v2070_v62 = vadd.f32 %v2069_v39, %v2057_v61 }
 0x1b9   :  { %v2032_v50 = vpop.f32.mrf.mxu2  ;;  %v2045_v52 = vpop.f32.mrf.mxu3 }
 0x1ba   :  { %2361 = vmatmul.bf16.vlgmr.msrb.gmra.mxu0 %v2154_v47 }
 0x1bd   :  { %v2058_v56 = vpop.f32.mrf.mxu0  ;;  %v2071_v36 = vpop.f32.mrf.mxu1 }
 0x1d1   :  { %v2082_v63 = vpop.f32.mrf.mxu2  ;;  %v2095_v0 = vpop.f32.mrf.mxu3 }
 0x1d2   :  { %v2083_v1 = vadd.f32 %v2082_v63, %v2070_v62 }
 0x1d4   :  { %v2096_v4 = vadd.f32 %v2095_v0, %v2083_v1 }
 0x1d5   :  { %v2108_v3 = vpop.f32.mrf.mxu0  ;;  %v2121_v23 = vpop.f32.mrf.mxu1 }
 0x1d6   :  { %v2152_v5 = vmax.f32 %v2096_v4, 0.0  ;;  %v2109_v12 = vadd.f32 %v2108_v3, %v1465_v11 }
 0x1d8   :  { %v2155_v54 = vpack.c.bf16 %v2152_v5, %v1331_v58  ;;  %v2122_v13 = vadd.f32 %v2121_v23, %v2109_v12 }
 0x1d9   :  { %v2084_v6 = vpop.f32.mrf.mxu2  ;;  %v2097_v55 = vpop.f32.mrf.mxu3 }
 0x1da   :  { %2375 = vmatmul.bf16.vlgmr.msra.gmra.mxu1 %v2155_v54 }
 0x1dd   :  { %v2110_v34 = vpop.f32.mrf.mxu0  ;;  %v2123_v9 = vpop.f32.mrf.mxu1 }
 0x1f1   :  { %v2134_v8 = vpop.f32.mrf.mxu2  ;;  %v2147_v15 = vpop.f32.mrf.mxu3 }
 0x1f2   :  { %v2135_v2 = vadd.f32 %v2134_v8, %v2122_v13 }
 0x1f4   :  { %v2148_v16 = vadd.f32 %v2147_v15, %v2135_v2 }
 0x1f6   :  { %v2153_v18 = vmax.f32 %v2148_v16, 0.0 }
 0x1f8   :  { %v2156_v19 = vpack.c.bf16 %v2153_v18, %v1332_v17 }
 0x1f9   :  { %v2136_v38 = vpop.f32.mrf.mxu2  ;;  %v2149_v7 = vpop.f32.mrf.mxu3 }
 0x1fa   :  { %2389 = vmatmul.bf16.vlgmr.msra.gmra.mxu2 %v2156_v19 }
 0x237   :  { %v2362_v24 = vpop.f32.mrf.mxu0 }
 0x238   :  { %v2363_v28 = vadd.f32 %v3573_v25, %v2362_v24 }
 0x23f   :  { %v2364_v14 = vpop.f32.mrf.mxu0 }
 0x240   :  { %v2365_v29 = vadd.f32 %v3573_v25, %v2364_v14 }
 0x257   :  { %v2376_v27 = vpop.f32.mrf.mxu1 }
 0x258   :  { %v2377_v43 = vadd.f32 %v2376_v27, %v2363_v28 }
 0x25f   :  { %v2378_v49 = vpop.f32.mrf.mxu1 }
 0x260   :  { %v2379_v20 = vadd.f32 %v2378_v49, %v2365_v29 }
 0x27d   :  { %v2390_v10 = vpop.f32.mrf.mxu2 }
 0x27e   :  { %v2391_v22 = vadd.f32 %v2390_v10, %v2377_v43 }
 0x280   :  { %2395 = vst [vmem:[#allocation16] sm:$0xff] %v2391_v22 }
 0x285   :  { %v2392_v30 = vpop.f32.mrf.mxu2 }
 0x286   :  { %v2393_v51 = vadd.f32 %v2392_v30, %v2379_v20 }
 0x288   :  { %2396 = vst [vmem:[#allocation16 + $0x8] sm:$0xff] %v2393_v51 }
 0x289   :  { %2409 = dma.vmem_to_hbm [thread:$0]  %s2402_s19, 256, %s2404_s0, [#allocation4], %s3817_s10, %s3817_s10, %s3818_s22  }
 0x28a   :  { %3800 = dma.done.wait [#allocation4], 256  }
 0x28b   :  { %3801 = vsyncadd [#allocation4], 4294967040 }
 0x28c   :  { %2414 = vsyncpa [#allocation3], 1 }
 0x28d   :  { %2415 = vsyncpa [#allocation6], 1 }
 0x28e   :  { %2416 = vsyncpa [#allocation9], 1 }
 0x28f   :  { %2417 = vsyncpa [#allocation12], 1 }
 0x290   :  { %2418 = vsyncpa [#allocation15], 1 }
 0x291   :  { %2419 = vsyncpa [#allocation4], 1 }

</bundles_post_ra>
